<compile_context>
chip_gen: v7x
topology: tpu7x:2x2x1
jax: 0.10.0
libtpu: 0.0.40
codegen_flags: <defaults>
</compile_context>

<pallas_src>
import functools

import jax
import jax.numpy as jnp
from jax import lax
from jax.experimental import pallas as pl
from jax.experimental.pallas import tpu as pltpu

# ------------------------- config (mirrors ConfigMetaCAT) -------------------------
VOCAB_SIZE  = 100
INPUT_SIZE  = 32                 # embedding size E
HIDDEN_SIZE = 32                 # total hidden size (both directions)
NUM_DIRS    = 2
NUM_LAYERS  = 2
NCLASSES    = 3
PADDING_IDX = 0
HD          = HIDDEN_SIZE // NUM_DIRS   # per-direction hidden size (16)
GATES       = 8 * HD                    # 128 gate lanes: [i_f,i_b,f_f,f_b,o_f,o_b,g_f,g_b]
BTILE       = 8                          # batch rows per grid step (one sublane tile)

B = 2        # real batch
T = 8        # sequence length
K = 2        # number of center positions per sample


# ------------------------------ fused Pallas kernel --------------------------------
def _fused_lstm_kernel(T_, BT_,
                       x_ref, keep_ref, cen_ref,
                       wih0_ref, whh0_ref, b0_ref,
                       wih1a_ref, wih1b_ref, whh1_ref, b1_ref,
                       fcw_ref, fcb_ref,
                       o_ref):
    """One batch-tile of the whole model, VMEM/vreg resident.

    x_ref    : (1, T*BT, 2E) bf-castable f32, row t*BT+b = [x[t,b], x[T-1-t,b]]
    keep_ref : (1, T*BT, 128) validity mask, lane-composed per direction
    cen_ref  : (1, T*BT, 128) center-position mask, lane-composed per direction
    weights  : packed so both directions of a layer advance with ONE bf16
               (BT,128)x(128,128) MXU push per time step.
    o_ref    : (BT, nclasses)
    """
    f32, bf16 = jnp.float32, jnp.bfloat16
    G = whh0_ref.shape[1]
    HD_ = G // 8
    # lanes [0, 6*HD) hold the sigmoid gates (i, f, o); [6*HD, 8*HD) the tanh gate (g)
    sig_lanes = lax.broadcasted_iota(jnp.int32, (1, G), 1) < 6 * HD_

    keep_all = keep_ref[0] > 0.0          # (T*BT, G) bool
    cen_all = cen_ref[0] > 0.0

    def cell(gx_s, h, c, whh):
        # gates/activations stay f32 (v5e has no bf16 VPU/EUP); only the MXU sees bf16
        gates = gx_s + jnp.dot(h.astype(bf16), whh, preferred_element_type=f32)
        act = jnp.where(sig_lanes, jax.nn.sigmoid(gates), jnp.tanh(gates))
        # align f / o / g blocks onto the state lanes [0, 2*HD) with XLU rotations
        f_al = pltpu.roll(act, 6 * HD_, 1)      # f block (lanes 2HD..4HD) -> 0
        o_al = pltpu.roll(act, 4 * HD_, 1)      # o block (lanes 4HD..6HD) -> 0
        g_al = pltpu.roll(act, 2 * HD_, 1)      # g block (lanes 6HD..8HD) -> 0
        c_new = f_al * c + act * g_al           # valid on lanes [0, 2*HD)
        h_new = o_al * jnp.tanh(c_new)
        return h_new, c_new

    # ---------------- layer 0: hoisted input projection (both dirs, all steps) ------
    gx0 = jnp.dot(x_ref[0].astype(bf16), wih0_ref[...],
                  preferred_element_type=f32) + b0_ref[...]
    whh0 = whh0_ref[...]
    h = jnp.zeros((BT_, G), f32)
    c = jnp.zeros((BT_, G), f32)
    y_list = []
    for s in range(T_):      # small static T: full unroll; use lax.fori_loop for large T
        r = slice(s * BT_, (s + 1) * BT_)
        h_new, c_new = cell(gx0[r, :], h, c, whh0)
        keep = keep_all[r, :]
        y_list.append(jnp.where(keep, h_new, 0.0))   # pad_packed zeros at invalid steps
        h = jnp.where(keep, h_new, h)
        c = jnp.where(keep, c_new, c)

    # ------- layer 1: input projection straight from vreg-resident layer-0 outputs --
    y_a = jnp.concatenate(y_list, axis=0).astype(bf16)          # block s: [yf[s], yr[T-1-s]]
    y_r = jnp.concatenate(y_list[::-1], axis=0).astype(bf16)    # block s: [yf[T-1-s], yr[s]]
    gx1 = (jnp.dot(y_a, wih1a_ref[...], preferred_element_type=f32)
           + jnp.dot(y_r, wih1b_ref[...], preferred_element_type=f32)
           + b1_ref[...])
    whh1 = whh1_ref[...]
    h = jnp.zeros((BT_, G), f32)
    c = jnp.zeros((BT_, G), f32)
    pooled = jnp.full((BT_, G), -1e30, f32)     # running max over center positions
    for s in range(T_):
        r = slice(s * BT_, (s + 1) * BT_)
        h_new, c_new = cell(gx1[r, :], h, c, whh1)
        keep = keep_all[r, :]
        h_out = jnp.where(keep, h_new, 0.0)
        pooled = jnp.where(cen_all[r, :], jnp.maximum(pooled, h_out), pooled)
        h = jnp.where(keep, h_new, h)
        c = jnp.where(keep, c_new, c)

    # ----------------------------------- head (fc1) ---------------------------------
    pooled = jnp.where(pooled > -1e29, pooled, 0.0)   # guard rows with no center hit
    o_ref[...] = jnp.dot(pooled, fcw_ref[...], preferred_element_type=f32) + fcb_ref[...]


# ----------------------------------- wrapper ---------------------------------------
def lstm_model_forward(packed, input_ids, center_positions):
    Bq, Tq = input_ids.shape
    NB = -(-Bq // BTILE)
    Bp = NB * BTILE
    padr = Bp - Bq

    ids = jnp.pad(input_ids, ((0, padr), (0, 0)), constant_values=PADDING_IDX)
    mask = ids != PADDING_IDX
    lengths = jnp.sum(mask, axis=1).astype(jnp.int32)

    # embedding lookup (glue) + time-major layout; fwd/rev inputs concatenated so the
    # per-direction input selection is a single packed matmul inside the kernel.
    x = jnp.take(packed["emb"], ids, axis=0)                     # (Bp, T, E)
    x_tm = jnp.transpose(x, (1, 0, 2))                           # (T, Bp, E)
    x_cat = jnp.concatenate([x_tm, x_tm[::-1]], axis=-1)         # (T, Bp, 2E)

    pos = jnp.arange(Tq, dtype=jnp.int32)
    valid = (pos[None, :] < lengths[:, None]).astype(jnp.float32)    # (Bp, T)
    valid_tm = valid.T                                                # (T, Bp)
    is_center = jnp.any(center_positions[:, :, None] == pos[None, None, :], axis=1)
    cen_tm = jnp.pad(is_center.astype(jnp.float32), ((0, padr), (0, 0))).T   # (T, Bp)

    # lane-composed masks: fwd lanes use time t, rev lanes use time T-1-t
    lane_fwd = ((jnp.arange(GATES) // HD) % 2 == 0)
    keep128 = jnp.where(lane_fwd[None, None, :], valid_tm[:, :, None], valid_tm[::-1, :, None])
    cen128 = jnp.where(lane_fwd[None, None, :], cen_tm[:, :, None], cen_tm[::-1, :, None])

    def tiles(a):   # (T, Bp, F) -> (NB, T*BTILE, F); batch-tile major rows = t*BTILE + b
        F = a.shape[-1]
        return a.reshape(Tq, NB, BTILE, F).transpose(1, 0, 2, 3).reshape(NB, Tq * BTILE, F)

    x_t, keep_t, cen_t = tiles(x_cat), tiles(keep128), tiles(cen128)

    kernel = functools.partial(_fused_lstm_kernel, Tq, BTILE)
    out = pl.pallas_call(
        kernel,
        out_shape=jax.ShapeDtypeStruct((Bp, NCLASSES), jnp.float32),
        grid=(NB,),
        in_specs=[
            pl.BlockSpec((1, Tq * BTILE, 2 * INPUT_SIZE), lambda i: (i, 0, 0)),
            pl.BlockSpec((1, Tq * BTILE, GATES), lambda i: (i, 0, 0)),
            pl.BlockSpec((1, Tq * BTILE, GATES), lambda i: (i, 0, 0)),
            pl.BlockSpec((2 * INPUT_SIZE, GATES), lambda i: (0, 0)),
            pl.BlockSpec((GATES, GATES), lambda i: (0, 0)),
            pl.BlockSpec((1, GATES), lambda i: (0, 0)),
            pl.BlockSpec((GATES, GATES), lambda i: (0, 0)),
            pl.BlockSpec((GATES, GATES), lambda i: (0, 0)),
            pl.BlockSpec((GATES, GATES), lambda i: (0, 0)),
            pl.BlockSpec((1, GATES), lambda i: (0, 0)),
            pl.BlockSpec((GATES, NCLASSES), lambda i: (0, 0)),
            pl.BlockSpec((1, NCLASSES), lambda i: (0, 0)),
        ],
        out_specs=pl.BlockSpec((BTILE, NCLASSES), lambda i: (i, 0)),
        compiler_params=pltpu.CompilerParams(dimension_semantics=("parallel",)),
    )(x_t, keep_t, cen_t,
      packed["wih0"], packed["whh0"], packed["b0"],
      packed["wih1a"], packed["wih1b"], packed["whh1"], packed["b1"],
      packed["fc1_w"], packed["fc1_b"])
    return out[:Bq]


# ----------------------------- parameter initialization ---------------------------
def init_params(key):
    """PyTorch-layout parameters: per-direction (D, 4*HD) weights, gate order (i,f,g,o)."""
    keys = jax.random.split(key, 3 + NUM_LAYERS * NUM_DIRS * 4)
    it = iter(keys)

    emb = jax.random.normal(next(it), (VOCAB_SIZE, INPUT_SIZE), jnp.float32) * 0.1
    emb = emb.at[PADDING_IDX].set(0.0)          # nn.Embedding(padding_idx) zero row

    k = float(1.0 / (HD ** 0.5))
    lstm = []
    for layer in range(NUM_LAYERS):
        in_dim = INPUT_SIZE if layer == 0 else NUM_DIRS * HD
        dirs = []
        for _ in range(NUM_DIRS):
            w_ih = jax.random.uniform(next(it), (in_dim, 4 * HD), jnp.float32, -k, k)
            w_hh = jax.random.uniform(next(it), (HD, 4 * HD), jnp.float32, -k, k)
            b_ih = jax.random.uniform(next(it), (1, 4 * HD), jnp.float32, -k, k)
            b_hh = jax.random.uniform(next(it), (1, 4 * HD), jnp.float32, -k, k)
            dirs.append((w_ih, w_hh, b_ih + b_hh))
        lstm.append(dirs)

    kf = float(1.0 / (HIDDEN_SIZE ** 0.5))
    fc1_w = jax.random.uniform(next(it), (HIDDEN_SIZE, NCLASSES), jnp.float32, -kf, kf)
    fc1_b = jax.random.uniform(next(it), (1, NCLASSES), jnp.float32, -kf, kf)
    return {"emb": emb, "lstm": lstm, "fc1_w": fc1_w, "fc1_b": fc1_b}


def pack_params(params):
    """Repack PyTorch-layout weights into the fused-kernel layout (done once, host side).

    Gate columns: [i_f,i_b,f_f,f_b,o_f,o_b,g_f,g_b] (HD lanes each). Row blocks are
    placed so fwd features only feed fwd gate columns and rev features only rev
    columns; unused rows are zero, so garbage lanes of the full-width state never
    leak into the matmuls. Matmul weights are pre-cast to bf16.
    """
    def _place(dst, w, row0, direction):
        # w: (r, 4*HD) torch gate order (i,f,g,o) -> our blocks (i,f,o,g)
        for j, g in enumerate((0, 1, 3, 2)):
            c0 = (2 * j + direction) * HD
            dst = dst.at[row0:row0 + w.shape[0], c0:c0 + HD].set(w[:, g * HD:(g + 1) * HD])
        return dst

    (wif0, whf0, bf0), (wib0, whb0, bb0) = params["lstm"][0]
    (wif1, whf1, bf1), (wib1, whb1, bb1) = params["lstm"][1]
    f32, bf16 = jnp.float32, jnp.bfloat16

    wih0 = _place(_place(jnp.zeros((2 * INPUT_SIZE, GATES), f32), wif0, 0, 0),
                  wib0, INPUT_SIZE, 1)
    whh0 = _place(_place(jnp.zeros((GATES, GATES), f32), whf0, 0, 0), whb0, HD, 1)
    b0 = _place(_place(jnp.zeros((1, GATES), f32), bf0, 0, 0), bb0, 0, 1)

    # layer-1 input weights, split across the two vreg-resident operands y_a / y_r:
    #   y_a block s = [yf[s] (rows 0:HD), yr[T-1-s] (rows HD:2HD)]
    #   y_r block s = [yf[T-1-s] (rows 0:HD), yr[s] (rows HD:2HD)]
    wih1a = _place(_place(jnp.zeros((GATES, GATES), f32), wif1[:HD], 0, 0),
                   wib1[HD:], HD, 1)
    wih1b = _place(_place(jnp.zeros((GATES, GATES), f32), wib1[:HD], 0, 1),
                   wif1[HD:], HD, 0)
    whh1 = _place(_place(jnp.zeros((GATES, GATES), f32), whf1, 0, 0), whb1, HD, 1)
    b1 = _place(_place(jnp.zeros((1, GATES), f32), bf1, 0, 0), bb1, 0, 1)

    fcw = jnp.zeros((GATES, NCLASSES), f32).at[:HIDDEN_SIZE].set(params["fc1_w"])

    return {"emb": params["emb"],
            "wih0": wih0.astype(bf16), "whh0": whh0.astype(bf16), "b0": b0,
            "wih1a": wih1a.astype(bf16), "wih1b": wih1b.astype(bf16),
            "whh1": whh1.astype(bf16), "b1": b1,
            "fc1_w": fcw, "fc1_b": params["fc1_b"]}


# ------------------------ pure-JAX reference (correctness) -------------------------
def _reference_forward(params, input_ids, center_positions):
    mask = input_ids != PADDING_IDX
    lengths = jnp.sum(mask, axis=1).astype(jnp.int32)
    x = jnp.take(params["emb"], input_ids, axis=0)               # (B, T, E)
    Bq, Tq, _ = x.shape

    def run_dir(xs, w_ih, w_hh, b, reverse):
        outs = jnp.zeros((Bq, Tq, HD), jnp.float32)
        h = jnp.zeros((Bq, HD), jnp.float32)
        c = jnp.zeros((Bq, HD), jnp.float32)
        order = range(Tq - 1, -1, -1) if reverse else range(Tq)
        for t in order:
            m_t = (t < lengths).astype(jnp.float32)[:, None]
            gates = xs[:, t, :] @ w_ih + h @ w_hh + b
            i_g = jax.nn.sigmoid(gates[:, 0 * HD:1 * HD])
            f_g = jax.nn.sigmoid(gates[:, 1 * HD:2 * HD])
            g_g = jnp.tanh(gates[:, 2 * HD:3 * HD])
            o_g = jax.nn.sigmoid(gates[:, 3 * HD:4 * HD])
            c_new = f_g * c + i_g * g_g
            h_new = o_g * jnp.tanh(c_new)
            outs = outs.at[:, t, :].set(h_new * m_t)
            h = h_new * m_t + h * (1.0 - m_t)
            c = c_new * m_t + c * (1.0 - m_t)
        return outs

    layer_in = x
    for layer in range(NUM_LAYERS):
        (wif, whf, bf), (wib, whb, bb) = params["lstm"][layer]
        out_f = run_dir(layer_in, wif, whf, bf, reverse=False)
        out_b = run_dir(layer_in, wib, whb, bb, reverse=True)
        layer_in = jnp.concatenate([out_f, out_b], axis=-1)
    gathered = layer_in[jnp.arange(Bq)[:, None], center_positions, :]
    pooled = jnp.max(gathered, axis=1)
    return pooled @ params["fc1_w"] + params["fc1_b"]


# -------------------------------------- main ---------------------------------------
if __name__ == "__main__":
    key = jax.random.PRNGKey(0)
    pkey, ikey = jax.random.split(key)
    params = init_params(pkey)
    packed = pack_params(params)

    input_ids = jax.random.randint(ikey, (B, T), 1, VOCAB_SIZE, dtype=jnp.int32)
    input_ids = input_ids.at[1, 5:].set(PADDING_IDX)       # lengths = [8, 5]
    center_positions = jnp.array([[2, 3], [1, 4]], dtype=jnp.int32)

    fwd = jax.jit(lstm_model_forward)
    logits = fwd(packed, input_ids, center_positions)
    jax.block_until_ready(logits)

    ref = _reference_forward(params, input_ids, center_positions)
    assert logits.shape == (B, NCLASSES) and logits.dtype == jnp.float32
    assert bool(jnp.allclose(logits, ref, atol=2e-2, rtol=2e-2))
    print("KERNEL_OK")
</pallas_src>

<mosaic_0001>
module attributes {stable_mosaic.version = 11 : i64} {
  func.func @_fused_lstm_kernel(%arg0: i32, %arg1: memref<1x64x64xf32, #tpu.memory_space<vmem>>, %arg2: memref<1x64x128xf32, #tpu.memory_space<vmem>>, %arg3: memref<1x64x128xf32, #tpu.memory_space<vmem>>, %arg4: memref<64x128xbf16, #tpu.memory_space<vmem>>, %arg5: memref<128x128xbf16, #tpu.memory_space<vmem>>, %arg6: memref<1x128xf32, #tpu.memory_space<vmem>>, %arg7: memref<128x128xbf16, #tpu.memory_space<vmem>>, %arg8: memref<128x128xbf16, #tpu.memory_space<vmem>>, %arg9: memref<128x128xbf16, #tpu.memory_space<vmem>>, %arg10: memref<1x128xf32, #tpu.memory_space<vmem>>, %arg11: memref<128x3xf32, #tpu.memory_space<vmem>>, %arg12: memref<1x3xf32, #tpu.memory_space<vmem>>, %arg13: memref<8x3xf32, #tpu.memory_space<vmem>>) attributes {dimension_semantics = [#tpu.dimension_semantics<parallel>], iteration_bounds = array<i64: 1>, scalar_prefetch = 0 : i64, scratch_operands = 0 : i64, tpu.core_type = #tpu.core_type<tc>, window_params = [{transform_indices = @transform_0, window_bounds = array<i64: 1, 64, 64>}, {transform_indices = @transform_1, window_bounds = array<i64: 1, 64, 128>}, {transform_indices = @transform_2, window_bounds = array<i64: 1, 64, 128>}, {pipeline_mode = #tpu.pipeline_mode<synchronous>, transform_indices = @transform_3, window_bounds = array<i64: 64, 128>}, {pipeline_mode = #tpu.pipeline_mode<synchronous>, transform_indices = @transform_4, window_bounds = array<i64: 128, 128>}, {pipeline_mode = #tpu.pipeline_mode<synchronous>, transform_indices = @transform_5, window_bounds = array<i64: 1, 128>}, {pipeline_mode = #tpu.pipeline_mode<synchronous>, transform_indices = @transform_6, window_bounds = array<i64: 128, 128>}, {pipeline_mode = #tpu.pipeline_mode<synchronous>, transform_indices = @transform_7, window_bounds = array<i64: 128, 128>}, {pipeline_mode = #tpu.pipeline_mode<synchronous>, transform_indices = @transform_8, window_bounds = array<i64: 128, 128>}, {pipeline_mode = #tpu.pipeline_mode<synchronous>, transform_indices = @transform_9, window_bounds = array<i64: 1, 128>}, {pipeline_mode = #tpu.pipeline_mode<synchronous>, transform_indices = @transform_10, window_bounds = array<i64: 128, 3>}, {pipeline_mode = #tpu.pipeline_mode<synchronous>, transform_indices = @transform_11, window_bounds = array<i64: 1, 3>}, {transform_indices = @transform_12, window_bounds = array<i64: 8, 3>}]} {
    %0 = tpu.iota {dimensions = array<i32: 1>} : vector<1x128xi32>
    %c96_i32 = arith.constant 96 : i32
    %1 = vector.broadcast %c96_i32 : i32 to vector<1x128xi32>
    %2 = arith.cmpi slt, %0, %1 : vector<1x128xi32>
    %c0 = arith.constant 0 : index
    %c0_0 = arith.constant 0 : index
    %c0_1 = arith.constant 0 : index
    %3 = vector.load %arg2[%c0, %c0_0, %c0_1] : memref<1x64x128xf32, #tpu.memory_space<vmem>>, vector<1x64x128xf32>
    %4 = vector.shape_cast %3 : vector<1x64x128xf32> to vector<64x128xf32>
    %cst = arith.constant 0.000000e+00 : f32
    %5 = vector.broadcast %cst : f32 to vector<64x128xf32>
    %6 = arith.cmpf ogt, %4, %5 : vector<64x128xf32>
    %c0_2 = arith.constant 0 : index
    %c0_3 = arith.constant 0 : index
    %c0_4 = arith.constant 0 : index
    %7 = vector.load %arg3[%c0_2, %c0_3, %c0_4] : memref<1x64x128xf32, #tpu.memory_space<vmem>>, vector<1x64x128xf32>
    %8 = vector.shape_cast %7 : vector<1x64x128xf32> to vector<64x128xf32>
    %cst_5 = arith.constant 0.000000e+00 : f32
    %9 = vector.broadcast %cst_5 : f32 to vector<64x128xf32>
    %10 = arith.cmpf ogt, %8, %9 : vector<64x128xf32>
    %c0_6 = arith.constant 0 : index
    %c0_7 = arith.constant 0 : index
    %c0_8 = arith.constant 0 : index
    %11 = vector.load %arg1[%c0_6, %c0_7, %c0_8] : memref<1x64x64xf32, #tpu.memory_space<vmem>>, vector<1x64x64xf32>
    %12 = vector.shape_cast %11 : vector<1x64x64xf32> to vector<64x64xf32>
    %13 = arith.truncf %12 : vector<64x64xf32> to vector<64x64xbf16>
    %c0_9 = arith.constant 0 : index
    %c0_10 = arith.constant 0 : index
    %14 = vector.load %arg4[%c0_9, %c0_10] : memref<64x128xbf16, #tpu.memory_space<vmem>>, vector<64x128xbf16>
    %cst_11 = arith.constant dense<0.000000e+00> : vector<64x128xf32>
    %15 = tpu.matmul %13, %14, %cst_11 {dimension_numbers = #tpu.dot_dimension_numbers<[1], [0], [0], [1], [0, 0, 1, 1], [], []>} : vector<64x64xbf16>, vector<64x128xbf16>, vector<64x128xf32> -> vector<64x128xf32>
    %c0_12 = arith.constant 0 : index
    %c0_13 = arith.constant 0 : index
    %16 = vector.load %arg6[%c0_12, %c0_13] : memref<1x128xf32, #tpu.memory_space<vmem>>, vector<1x128xf32>
    %17 = vector.broadcast %16 : vector<1x128xf32> to vector<64x128xf32>
    %18 = arith.addf %15, %17 : vector<64x128xf32>
    %c0_14 = arith.constant 0 : index
    %c0_15 = arith.constant 0 : index
    %19 = vector.load %arg5[%c0_14, %c0_15] : memref<128x128xbf16, #tpu.memory_space<vmem>>, vector<128x128xbf16>
    %cst_16 = arith.constant 0.000000e+00 : f32
    %20 = vector.broadcast %cst_16 : f32 to vector<8x128xf32>
    %cst_17 = arith.constant 0.000000e+00 : f32
    %21 = vector.broadcast %cst_17 : f32 to vector<8x128xf32>
    %22 = vector.extract_strided_slice %18 {offsets = [0, 0], sizes = [8, 128], strides = [1, 1]} : vector<64x128xf32> to vector<8x128xf32>
    %23 = arith.truncf %20 : vector<8x128xf32> to vector<8x128xbf16>
    %cst_18 = arith.constant dense<0.000000e+00> : vector<8x128xf32>
    %24 = tpu.matmul %23, %19, %cst_18 {dimension_numbers = #tpu.dot_dimension_numbers<[1], [0], [0], [1], [0, 0, 1, 1], [], []>} : vector<8x128xbf16>, vector<128x128xbf16>, vector<8x128xf32> -> vector<8x128xf32>
    %25 = arith.addf %22, %24 : vector<8x128xf32>
    %26 = arith.negf %25 : vector<8x128xf32>
    %27 = math.exp %26 : vector<8x128xf32>
    %cst_19 = arith.constant 1.000000e+00 : f32
    %28 = vector.broadcast %cst_19 : f32 to vector<8x128xf32>
    %29 = arith.addf %28, %27 : vector<8x128xf32>
    %30 = arith.divf %28, %29 : vector<8x128xf32>
    %31 = math.tanh %25 : vector<8x128xf32>
    %32 = vector.shape_cast %2 : vector<1x128xi1> to vector<1x128xi1>
    %33 = vector.broadcast %32 : vector<1x128xi1> to vector<8x128xi1>
    %34 = arith.select %33, %30, %31 : vector<8x128xi1>, vector<8x128xf32>
    %c96_i32_20 = arith.constant 96 : i32
    %35 = tpu.dynamic_rotate %34 by %c96_i32_20 dim 1 : vector<8x128xf32>, i32 -> vector<8x128xf32>
    %c64_i32 = arith.constant 64 : i32
    %36 = tpu.dynamic_rotate %34 by %c64_i32 dim 1 : vector<8x128xf32>, i32 -> vector<8x128xf32>
    %c32_i32 = arith.constant 32 : i32
    %37 = tpu.dynamic_rotate %34 by %c32_i32 dim 1 : vector<8x128xf32>, i32 -> vector<8x128xf32>
    %38 = arith.mulf %35, %21 : vector<8x128xf32>
    %39 = arith.mulf %34, %37 : vector<8x128xf32>
    %40 = arith.addf %38, %39 : vector<8x128xf32>
    %41 = math.tanh %40 : vector<8x128xf32>
    %42 = arith.mulf %36, %41 : vector<8x128xf32>
    %43 = vector.extract_strided_slice %6 {offsets = [0, 0], sizes = [8, 128], strides = [1, 1]} : vector<64x128xi1> to vector<8x128xi1>
    %cst_21 = arith.constant 0.000000e+00 : f32
    %44 = vector.broadcast %cst_21 : f32 to vector<8x128xf32>
    %45 = arith.select %43, %42, %44 : vector<8x128xi1>, vector<8x128xf32>
    %46 = arith.select %43, %42, %20 : vector<8x128xi1>, vector<8x128xf32>
    %47 = arith.select %43, %40, %21 : vector<8x128xi1>, vector<8x128xf32>
    %48 = vector.extract_strided_slice %18 {offsets = [8, 0], sizes = [8, 128], strides = [1, 1]} : vector<64x128xf32> to vector<8x128xf32>
    %49 = arith.truncf %46 : vector<8x128xf32> to vector<8x128xbf16>
    %cst_22 = arith.constant dense<0.000000e+00> : vector<8x128xf32>
    %50 = tpu.matmul %49, %19, %cst_22 {dimension_numbers = #tpu.dot_dimension_numbers<[1], [0], [0], [1], [0, 0, 1, 1], [], []>} : vector<8x128xbf16>, vector<128x128xbf16>, vector<8x128xf32> -> vector<8x128xf32>
    %51 = arith.addf %48, %50 : vector<8x128xf32>
    %52 = arith.negf %51 : vector<8x128xf32>
    %53 = math.exp %52 : vector<8x128xf32>
    %cst_23 = arith.constant 1.000000e+00 : f32
    %54 = vector.broadcast %cst_23 : f32 to vector<8x128xf32>
    %55 = arith.addf %54, %53 : vector<8x128xf32>
    %56 = arith.divf %54, %55 : vector<8x128xf32>
    %57 = math.tanh %51 : vector<8x128xf32>
    %58 = vector.shape_cast %2 : vector<1x128xi1> to vector<1x128xi1>
    %59 = vector.broadcast %58 : vector<1x128xi1> to vector<8x128xi1>
    %60 = arith.select %59, %56, %57 : vector<8x128xi1>, vector<8x128xf32>
    %c96_i32_24 = arith.constant 96 : i32
    %61 = tpu.dynamic_rotate %60 by %c96_i32_24 dim 1 : vector<8x128xf32>, i32 -> vector<8x128xf32>
    %c64_i32_25 = arith.constant 64 : i32
    %62 = tpu.dynamic_rotate %60 by %c64_i32_25 dim 1 : vector<8x128xf32>, i32 -> vector<8x128xf32>
    %c32_i32_26 = arith.constant 32 : i32
    %63 = tpu.dynamic_rotate %60 by %c32_i32_26 dim 1 : vector<8x128xf32>, i32 -> vector<8x128xf32>
    %64 = arith.mulf %61, %47 : vector<8x128xf32>
    %65 = arith.mulf %60, %63 : vector<8x128xf32>
    %66 = arith.addf %64, %65 : vector<8x128xf32>
    %67 = math.tanh %66 : vector<8x128xf32>
    %68 = arith.mulf %62, %67 : vector<8x128xf32>
    %69 = vector.extract_strided_slice %6 {offsets = [8, 0], sizes = [8, 128], strides = [1, 1]} : vector<64x128xi1> to vector<8x128xi1>
    %cst_27 = arith.constant 0.000000e+00 : f32
    %70 = vector.broadcast %cst_27 : f32 to vector<8x128xf32>
    %71 = arith.select %69, %68, %70 : vector<8x128xi1>, vector<8x128xf32>
    %72 = arith.select %69, %68, %46 : vector<8x128xi1>, vector<8x128xf32>
    %73 = arith.select %69, %66, %47 : vector<8x128xi1>, vector<8x128xf32>
    %74 = vector.extract_strided_slice %18 {offsets = [16, 0], sizes = [8, 128], strides = [1, 1]} : vector<64x128xf32> to vector<8x128xf32>
    %75 = arith.truncf %72 : vector<8x128xf32> to vector<8x128xbf16>
    %cst_28 = arith.constant dense<0.000000e+00> : vector<8x128xf32>
    %76 = tpu.matmul %75, %19, %cst_28 {dimension_numbers = #tpu.dot_dimension_numbers<[1], [0], [0], [1], [0, 0, 1, 1], [], []>} : vector<8x128xbf16>, vector<128x128xbf16>, vector<8x128xf32> -> vector<8x128xf32>
    %77 = arith.addf %74, %76 : vector<8x128xf32>
    %78 = arith.negf %77 : vector<8x128xf32>
    %79 = math.exp %78 : vector<8x128xf32>
    %cst_29 = arith.constant 1.000000e+00 : f32
    %80 = vector.broadcast %cst_29 : f32 to vector<8x128xf32>
    %81 = arith.addf %80, %79 : vector<8x128xf32>
    %82 = arith.divf %80, %81 : vector<8x128xf32>
    %83 = math.tanh %77 : vector<8x128xf32>
    %84 = vector.shape_cast %2 : vector<1x128xi1> to vector<1x128xi1>
    %85 = vector.broadcast %84 : vector<1x128xi1> to vector<8x128xi1>
    %86 = arith.select %85, %82, %83 : vector<8x128xi1>, vector<8x128xf32>
    %c96_i32_30 = arith.constant 96 : i32
    %87 = tpu.dynamic_rotate %86 by %c96_i32_30 dim 1 : vector<8x128xf32>, i32 -> vector<8x128xf32>
    %c64_i32_31 = arith.constant 64 : i32
    %88 = tpu.dynamic_rotate %86 by %c64_i32_31 dim 1 : vector<8x128xf32>, i32 -> vector<8x128xf32>
    %c32_i32_32 = arith.constant 32 : i32
    %89 = tpu.dynamic_rotate %86 by %c32_i32_32 dim 1 : vector<8x128xf32>, i32 -> vector<8x128xf32>
    %90 = arith.mulf %87, %73 : vector<8x128xf32>
    %91 = arith.mulf %86, %89 : vector<8x128xf32>
    %92 = arith.addf %90, %91 : vector<8x128xf32>
    %93 = math.tanh %92 : vector<8x128xf32>
    %94 = arith.mulf %88, %93 : vector<8x128xf32>
    %95 = vector.extract_strided_slice %6 {offsets = [16, 0], sizes = [8, 128], strides = [1, 1]} : vector<64x128xi1> to vector<8x128xi1>
    %cst_33 = arith.constant 0.000000e+00 : f32
    %96 = vector.broadcast %cst_33 : f32 to vector<8x128xf32>
    %97 = arith.select %95, %94, %96 : vector<8x128xi1>, vector<8x128xf32>
    %98 = arith.select %95, %94, %72 : vector<8x128xi1>, vector<8x128xf32>
    %99 = arith.select %95, %92, %73 : vector<8x128xi1>, vector<8x128xf32>
    %100 = vector.extract_strided_slice %18 {offsets = [24, 0], sizes = [8, 128], strides = [1, 1]} : vector<64x128xf32> to vector<8x128xf32>
    %101 = arith.truncf %98 : vector<8x128xf32> to vector<8x128xbf16>
    %cst_34 = arith.constant dense<0.000000e+00> : vector<8x128xf32>
    %102 = tpu.matmul %101, %19, %cst_34 {dimension_numbers = #tpu.dot_dimension_numbers<[1], [0], [0], [1], [0, 0, 1, 1], [], []>} : vector<8x128xbf16>, vector<128x128xbf16>, vector<8x128xf32> -> vector<8x128xf32>
    %103 = arith.addf %100, %102 : vector<8x128xf32>
    %104 = arith.negf %103 : vector<8x128xf32>
    %105 = math.exp %104 : vector<8x128xf32>
    %cst_35 = arith.constant 1.000000e+00 : f32
    %106 = vector.broadcast %cst_35 : f32 to vector<8x128xf32>
    %107 = arith.addf %106, %105 : vector<8x128xf32>
    %108 = arith.divf %106, %107 : vector<8x128xf32>
    %109 = math.tanh %103 : vector<8x128xf32>
    %110 = vector.shape_cast %2 : vector<1x128xi1> to vector<1x128xi1>
    %111 = vector.broadcast %110 : vector<1x128xi1> to vector<8x128xi1>
    %112 = arith.select %111, %108, %109 : vector<8x128xi1>, vector<8x128xf32>
    %c96_i32_36 = arith.constant 96 : i32
    %113 = tpu.dynamic_rotate %112 by %c96_i32_36 dim 1 : vector<8x128xf32>, i32 -> vector<8x128xf32>
    %c64_i32_37 = arith.constant 64 : i32
    %114 = tpu.dynamic_rotate %112 by %c64_i32_37 dim 1 : vector<8x128xf32>, i32 -> vector<8x128xf32>
    %c32_i32_38 = arith.constant 32 : i32
    %115 = tpu.dynamic_rotate %112 by %c32_i32_38 dim 1 : vector<8x128xf32>, i32 -> vector<8x128xf32>
    %116 = arith.mulf %113, %99 : vector<8x128xf32>
    %117 = arith.mulf %112, %115 : vector<8x128xf32>
    %118 = arith.addf %116, %117 : vector<8x128xf32>
    %119 = math.tanh %118 : vector<8x128xf32>
    %120 = arith.mulf %114, %119 : vector<8x128xf32>
    %121 = vector.extract_strided_slice %6 {offsets = [24, 0], sizes = [8, 128], strides = [1, 1]} : vector<64x128xi1> to vector<8x128xi1>
    %cst_39 = arith.constant 0.000000e+00 : f32
    %122 = vector.broadcast %cst_39 : f32 to vector<8x128xf32>
    %123 = arith.select %121, %120, %122 : vector<8x128xi1>, vector<8x128xf32>
    %124 = arith.select %121, %120, %98 : vector<8x128xi1>, vector<8x128xf32>
    %125 = arith.select %121, %118, %99 : vector<8x128xi1>, vector<8x128xf32>
    %126 = vector.extract_strided_slice %18 {offsets = [32, 0], sizes = [8, 128], strides = [1, 1]} : vector<64x128xf32> to vector<8x128xf32>
    %127 = arith.truncf %124 : vector<8x128xf32> to vector<8x128xbf16>
    %cst_40 = arith.constant dense<0.000000e+00> : vector<8x128xf32>
    %128 = tpu.matmul %127, %19, %cst_40 {dimension_numbers = #tpu.dot_dimension_numbers<[1], [0], [0], [1], [0, 0, 1, 1], [], []>} : vector<8x128xbf16>, vector<128x128xbf16>, vector<8x128xf32> -> vector<8x128xf32>
    %129 = arith.addf %126, %128 : vector<8x128xf32>
    %130 = arith.negf %129 : vector<8x128xf32>
    %131 = math.exp %130 : vector<8x128xf32>
    %cst_41 = arith.constant 1.000000e+00 : f32
    %132 = vector.broadcast %cst_41 : f32 to vector<8x128xf32>
    %133 = arith.addf %132, %131 : vector<8x128xf32>
    %134 = arith.divf %132, %133 : vector<8x128xf32>
    %135 = math.tanh %129 : vector<8x128xf32>
    %136 = vector.shape_cast %2 : vector<1x128xi1> to vector<1x128xi1>
    %137 = vector.broadcast %136 : vector<1x128xi1> to vector<8x128xi1>
    %138 = arith.select %137, %134, %135 : vector<8x128xi1>, vector<8x128xf32>
    %c96_i32_42 = arith.constant 96 : i32
    %139 = tpu.dynamic_rotate %138 by %c96_i32_42 dim 1 : vector<8x128xf32>, i32 -> vector<8x128xf32>
    %c64_i32_43 = arith.constant 64 : i32
    %140 = tpu.dynamic_rotate %138 by %c64_i32_43 dim 1 : vector<8x128xf32>, i32 -> vector<8x128xf32>
    %c32_i32_44 = arith.constant 32 : i32
    %141 = tpu.dynamic_rotate %138 by %c32_i32_44 dim 1 : vector<8x128xf32>, i32 -> vector<8x128xf32>
    %142 = arith.mulf %139, %125 : vector<8x128xf32>
    %143 = arith.mulf %138, %141 : vector<8x128xf32>
    %144 = arith.addf %142, %143 : vector<8x128xf32>
    %145 = math.tanh %144 : vector<8x128xf32>
    %146 = arith.mulf %140, %145 : vector<8x128xf32>
    %147 = vector.extract_strided_slice %6 {offsets = [32, 0], sizes = [8, 128], strides = [1, 1]} : vector<64x128xi1> to vector<8x128xi1>
    %cst_45 = arith.constant 0.000000e+00 : f32
    %148 = vector.broadcast %cst_45 : f32 to vector<8x128xf32>
    %149 = arith.select %147, %146, %148 : vector<8x128xi1>, vector<8x128xf32>
    %150 = arith.select %147, %146, %124 : vector<8x128xi1>, vector<8x128xf32>
    %151 = arith.select %147, %144, %125 : vector<8x128xi1>, vector<8x128xf32>
    %152 = vector.extract_strided_slice %18 {offsets = [40, 0], sizes = [8, 128], strides = [1, 1]} : vector<64x128xf32> to vector<8x128xf32>
    %153 = arith.truncf %150 : vector<8x128xf32> to vector<8x128xbf16>
    %cst_46 = arith.constant dense<0.000000e+00> : vector<8x128xf32>
    %154 = tpu.matmul %153, %19, %cst_46 {dimension_numbers = #tpu.dot_dimension_numbers<[1], [0], [0], [1], [0, 0, 1, 1], [], []>} : vector<8x128xbf16>, vector<128x128xbf16>, vector<8x128xf32> -> vector<8x128xf32>
    %155 = arith.addf %152, %154 : vector<8x128xf32>
    %156 = arith.negf %155 : vector<8x128xf32>
    %157 = math.exp %156 : vector<8x128xf32>
    %cst_47 = arith.constant 1.000000e+00 : f32
    %158 = vector.broadcast %cst_47 : f32 to vector<8x128xf32>
    %159 = arith.addf %158, %157 : vector<8x128xf32>
    %160 = arith.divf %158, %159 : vector<8x128xf32>
    %161 = math.tanh %155 : vector<8x128xf32>
    %162 = vector.shape_cast %2 : vector<1x128xi1> to vector<1x128xi1>
    %163 = vector.broadcast %162 : vector<1x128xi1> to vector<8x128xi1>
    %164 = arith.select %163, %160, %161 : vector<8x128xi1>, vector<8x128xf32>
    %c96_i32_48 = arith.constant 96 : i32
    %165 = tpu.dynamic_rotate %164 by %c96_i32_48 dim 1 : vector<8x128xf32>, i32 -> vector<8x128xf32>
    %c64_i32_49 = arith.constant 64 : i32
    %166 = tpu.dynamic_rotate %164 by %c64_i32_49 dim 1 : vector<8x128xf32>, i32 -> vector<8x128xf32>
    %c32_i32_50 = arith.constant 32 : i32
    %167 = tpu.dynamic_rotate %164 by %c32_i32_50 dim 1 : vector<8x128xf32>, i32 -> vector<8x128xf32>
    %168 = arith.mulf %165, %151 : vector<8x128xf32>
    %169 = arith.mulf %164, %167 : vector<8x128xf32>
    %170 = arith.addf %168, %169 : vector<8x128xf32>
    %171 = math.tanh %170 : vector<8x128xf32>
    %172 = arith.mulf %166, %171 : vector<8x128xf32>
    %173 = vector.extract_strided_slice %6 {offsets = [40, 0], sizes = [8, 128], strides = [1, 1]} : vector<64x128xi1> to vector<8x128xi1>
    %cst_51 = arith.constant 0.000000e+00 : f32
    %174 = vector.broadcast %cst_51 : f32 to vector<8x128xf32>
    %175 = arith.select %173, %172, %174 : vector<8x128xi1>, vector<8x128xf32>
    %176 = arith.select %173, %172, %150 : vector<8x128xi1>, vector<8x128xf32>
    %177 = arith.select %173, %170, %151 : vector<8x128xi1>, vector<8x128xf32>
    %178 = vector.extract_strided_slice %18 {offsets = [48, 0], sizes = [8, 128], strides = [1, 1]} : vector<64x128xf32> to vector<8x128xf32>
    %179 = arith.truncf %176 : vector<8x128xf32> to vector<8x128xbf16>
    %cst_52 = arith.constant dense<0.000000e+00> : vector<8x128xf32>
    %180 = tpu.matmul %179, %19, %cst_52 {dimension_numbers = #tpu.dot_dimension_numbers<[1], [0], [0], [1], [0, 0, 1, 1], [], []>} : vector<8x128xbf16>, vector<128x128xbf16>, vector<8x128xf32> -> vector<8x128xf32>
    %181 = arith.addf %178, %180 : vector<8x128xf32>
    %182 = arith.negf %181 : vector<8x128xf32>
    %183 = math.exp %182 : vector<8x128xf32>
    %cst_53 = arith.constant 1.000000e+00 : f32
    %184 = vector.broadcast %cst_53 : f32 to vector<8x128xf32>
    %185 = arith.addf %184, %183 : vector<8x128xf32>
    %186 = arith.divf %184, %185 : vector<8x128xf32>
    %187 = math.tanh %181 : vector<8x128xf32>
    %188 = vector.shape_cast %2 : vector<1x128xi1> to vector<1x128xi1>
    %189 = vector.broadcast %188 : vector<1x128xi1> to vector<8x128xi1>
    %190 = arith.select %189, %186, %187 : vector<8x128xi1>, vector<8x128xf32>
    %c96_i32_54 = arith.constant 96 : i32
    %191 = tpu.dynamic_rotate %190 by %c96_i32_54 dim 1 : vector<8x128xf32>, i32 -> vector<8x128xf32>
    %c64_i32_55 = arith.constant 64 : i32
    %192 = tpu.dynamic_rotate %190 by %c64_i32_55 dim 1 : vector<8x128xf32>, i32 -> vector<8x128xf32>
    %c32_i32_56 = arith.constant 32 : i32
    %193 = tpu.dynamic_rotate %190 by %c32_i32_56 dim 1 : vector<8x128xf32>, i32 -> vector<8x128xf32>
    %194 = arith.mulf %191, %177 : vector<8x128xf32>
    %195 = arith.mulf %190, %193 : vector<8x128xf32>
    %196 = arith.addf %194, %195 : vector<8x128xf32>
    %197 = math.tanh %196 : vector<8x128xf32>
    %198 = arith.mulf %192, %197 : vector<8x128xf32>
    %199 = vector.extract_strided_slice %6 {offsets = [48, 0], sizes = [8, 128], strides = [1, 1]} : vector<64x128xi1> to vector<8x128xi1>
    %cst_57 = arith.constant 0.000000e+00 : f32
    %200 = vector.broadcast %cst_57 : f32 to vector<8x128xf32>
    %201 = arith.select %199, %198, %200 : vector<8x128xi1>, vector<8x128xf32>
    %202 = arith.select %199, %198, %176 : vector<8x128xi1>, vector<8x128xf32>
    %203 = arith.select %199, %196, %177 : vector<8x128xi1>, vector<8x128xf32>
    %204 = vector.extract_strided_slice %18 {offsets = [56, 0], sizes = [8, 128], strides = [1, 1]} : vector<64x128xf32> to vector<8x128xf32>
    %205 = arith.truncf %202 : vector<8x128xf32> to vector<8x128xbf16>
    %cst_58 = arith.constant dense<0.000000e+00> : vector<8x128xf32>
    %206 = tpu.matmul %205, %19, %cst_58 {dimension_numbers = #tpu.dot_dimension_numbers<[1], [0], [0], [1], [0, 0, 1, 1], [], []>} : vector<8x128xbf16>, vector<128x128xbf16>, vector<8x128xf32> -> vector<8x128xf32>
    %207 = arith.addf %204, %206 : vector<8x128xf32>
    %208 = arith.negf %207 : vector<8x128xf32>
    %209 = math.exp %208 : vector<8x128xf32>
    %cst_59 = arith.constant 1.000000e+00 : f32
    %210 = vector.broadcast %cst_59 : f32 to vector<8x128xf32>
    %211 = arith.addf %210, %209 : vector<8x128xf32>
    %212 = arith.divf %210, %211 : vector<8x128xf32>
    %213 = math.tanh %207 : vector<8x128xf32>
    %214 = vector.shape_cast %2 : vector<1x128xi1> to vector<1x128xi1>
    %215 = vector.broadcast %214 : vector<1x128xi1> to vector<8x128xi1>
    %216 = arith.select %215, %212, %213 : vector<8x128xi1>, vector<8x128xf32>
    %c96_i32_60 = arith.constant 96 : i32
    %217 = tpu.dynamic_rotate %216 by %c96_i32_60 dim 1 : vector<8x128xf32>, i32 -> vector<8x128xf32>
    %c64_i32_61 = arith.constant 64 : i32
    %218 = tpu.dynamic_rotate %216 by %c64_i32_61 dim 1 : vector<8x128xf32>, i32 -> vector<8x128xf32>
    %c32_i32_62 = arith.constant 32 : i32
    %219 = tpu.dynamic_rotate %216 by %c32_i32_62 dim 1 : vector<8x128xf32>, i32 -> vector<8x128xf32>
    %220 = arith.mulf %217, %203 : vector<8x128xf32>
    %221 = arith.mulf %216, %219 : vector<8x128xf32>
    %222 = arith.addf %220, %221 : vector<8x128xf32>
    %223 = math.tanh %222 : vector<8x128xf32>
    %224 = arith.mulf %218, %223 : vector<8x128xf32>
    %225 = vector.extract_strided_slice %6 {offsets = [56, 0], sizes = [8, 128], strides = [1, 1]} : vector<64x128xi1> to vector<8x128xi1>
    %cst_63 = arith.constant 0.000000e+00 : f32
    %226 = vector.broadcast %cst_63 : f32 to vector<8x128xf32>
    %227 = arith.select %225, %224, %226 : vector<8x128xi1>, vector<8x128xf32>
    %228 = tpu.concatenate %45, %71, %97, %123, %149, %175, %201, %227 in 0 : vector<8x128xf32>, vector<8x128xf32>, vector<8x128xf32>, vector<8x128xf32>, vector<8x128xf32>, vector<8x128xf32>, vector<8x128xf32>, vector<8x128xf32> -> vector<64x128xf32>
    %229 = arith.truncf %228 : vector<64x128xf32> to vector<64x128xbf16>
    %230 = tpu.concatenate %227, %201, %175, %149, %123, %97, %71, %45 in 0 : vector<8x128xf32>, vector<8x128xf32>, vector<8x128xf32>, vector<8x128xf32>, vector<8x128xf32>, vector<8x128xf32>, vector<8x128xf32>, vector<8x128xf32> -> vector<64x128xf32>
    %231 = arith.truncf %230 : vector<64x128xf32> to vector<64x128xbf16>
    %c0_64 = arith.constant 0 : index
    %c0_65 = arith.constant 0 : index
    %232 = vector.load %arg7[%c0_64, %c0_65] : memref<128x128xbf16, #tpu.memory_space<vmem>>, vector<128x128xbf16>
    %cst_66 = arith.constant dense<0.000000e+00> : vector<64x128xf32>
    %233 = tpu.matmul %229, %232, %cst_66 {dimension_numbers = #tpu.dot_dimension_numbers<[1], [0], [0], [1], [0, 0, 1, 1], [], []>} : vector<64x128xbf16>, vector<128x128xbf16>, vector<64x128xf32> -> vector<64x128xf32>
    %c0_67 = arith.constant 0 : index
    %c0_68 = arith.constant 0 : index
    %234 = vector.load %arg8[%c0_67, %c0_68] : memref<128x128xbf16, #tpu.memory_space<vmem>>, vector<128x128xbf16>
    %cst_69 = arith.constant dense<0.000000e+00> : vector<64x128xf32>
    %235 = tpu.matmul %231, %234, %cst_69 {dimension_numbers = #tpu.dot_dimension_numbers<[1], [0], [0], [1], [0, 0, 1, 1], [], []>} : vector<64x128xbf16>, vector<128x128xbf16>, vector<64x128xf32> -> vector<64x128xf32>
    %236 = arith.addf %233, %235 : vector<64x128xf32>
    %c0_70 = arith.constant 0 : index
    %c0_71 = arith.constant 0 : index
    %237 = vector.load %arg10[%c0_70, %c0_71] : memref<1x128xf32, #tpu.memory_space<vmem>>, vector<1x128xf32>
    %238 = vector.broadcast %237 : vector<1x128xf32> to vector<64x128xf32>
    %239 = arith.addf %236, %238 : vector<64x128xf32>
    %c0_72 = arith.constant 0 : index
    %c0_73 = arith.constant 0 : index
    %240 = vector.load %arg9[%c0_72, %c0_73] : memref<128x128xbf16, #tpu.memory_space<vmem>>, vector<128x128xbf16>
    %cst_74 = arith.constant 0.000000e+00 : f32
    %241 = vector.broadcast %cst_74 : f32 to vector<8x128xf32>
    %cst_75 = arith.constant 0.000000e+00 : f32
    %242 = vector.broadcast %cst_75 : f32 to vector<8x128xf32>
    %cst_76 = arith.constant -1.000000e+30 : f32
    %243 = vector.broadcast %cst_76 : f32 to vector<8x128xf32>
    %244 = vector.extract_strided_slice %239 {offsets = [0, 0], sizes = [8, 128], strides = [1, 1]} : vector<64x128xf32> to vector<8x128xf32>
    %245 = arith.truncf %241 : vector<8x128xf32> to vector<8x128xbf16>
    %cst_77 = arith.constant dense<0.000000e+00> : vector<8x128xf32>
    %246 = tpu.matmul %245, %240, %cst_77 {dimension_numbers = #tpu.dot_dimension_numbers<[1], [0], [0], [1], [0, 0, 1, 1], [], []>} : vector<8x128xbf16>, vector<128x128xbf16>, vector<8x128xf32> -> vector<8x128xf32>
    %247 = arith.addf %244, %246 : vector<8x128xf32>
    %248 = arith.negf %247 : vector<8x128xf32>
    %249 = math.exp %248 : vector<8x128xf32>
    %cst_78 = arith.constant 1.000000e+00 : f32
    %250 = vector.broadcast %cst_78 : f32 to vector<8x128xf32>
    %251 = arith.addf %250, %249 : vector<8x128xf32>
    %252 = arith.divf %250, %251 : vector<8x128xf32>
    %253 = math.tanh %247 : vector<8x128xf32>
    %254 = vector.shape_cast %2 : vector<1x128xi1> to vector<1x128xi1>
    %255 = vector.broadcast %254 : vector<1x128xi1> to vector<8x128xi1>
    %256 = arith.select %255, %252, %253 : vector<8x128xi1>, vector<8x128xf32>
    %c96_i32_79 = arith.constant 96 : i32
    %257 = tpu.dynamic_rotate %256 by %c96_i32_79 dim 1 : vector<8x128xf32>, i32 -> vector<8x128xf32>
    %c64_i32_80 = arith.constant 64 : i32
    %258 = tpu.dynamic_rotate %256 by %c64_i32_80 dim 1 : vector<8x128xf32>, i32 -> vector<8x128xf32>
    %c32_i32_81 = arith.constant 32 : i32
    %259 = tpu.dynamic_rotate %256 by %c32_i32_81 dim 1 : vector<8x128xf32>, i32 -> vector<8x128xf32>
    %260 = arith.mulf %257, %242 : vector<8x128xf32>
    %261 = arith.mulf %256, %259 : vector<8x128xf32>
    %262 = arith.addf %260, %261 : vector<8x128xf32>
    %263 = math.tanh %262 : vector<8x128xf32>
    %264 = arith.mulf %258, %263 : vector<8x128xf32>
    %265 = vector.extract_strided_slice %6 {offsets = [0, 0], sizes = [8, 128], strides = [1, 1]} : vector<64x128xi1> to vector<8x128xi1>
    %cst_82 = arith.constant 0.000000e+00 : f32
    %266 = vector.broadcast %cst_82 : f32 to vector<8x128xf32>
    %267 = arith.select %265, %264, %266 : vector<8x128xi1>, vector<8x128xf32>
    %268 = vector.extract_strided_slice %10 {offsets = [0, 0], sizes = [8, 128], strides = [1, 1]} : vector<64x128xi1> to vector<8x128xi1>
    %269 = arith.maximumf %243, %267 : vector<8x128xf32>
    %270 = arith.select %268, %269, %243 : vector<8x128xi1>, vector<8x128xf32>
    %271 = arith.select %265, %264, %241 : vector<8x128xi1>, vector<8x128xf32>
    %272 = arith.select %265, %262, %242 : vector<8x128xi1>, vector<8x128xf32>
    %273 = vector.extract_strided_slice %239 {offsets = [8, 0], sizes = [8, 128], strides = [1, 1]} : vector<64x128xf32> to vector<8x128xf32>
    %274 = arith.truncf %271 : vector<8x128xf32> to vector<8x128xbf16>
    %cst_83 = arith.constant dense<0.000000e+00> : vector<8x128xf32>
    %275 = tpu.matmul %274, %240, %cst_83 {dimension_numbers = #tpu.dot_dimension_numbers<[1], [0], [0], [1], [0, 0, 1, 1], [], []>} : vector<8x128xbf16>, vector<128x128xbf16>, vector<8x128xf32> -> vector<8x128xf32>
    %276 = arith.addf %273, %275 : vector<8x128xf32>
    %277 = arith.negf %276 : vector<8x128xf32>
    %278 = math.exp %277 : vector<8x128xf32>
    %cst_84 = arith.constant 1.000000e+00 : f32
    %279 = vector.broadcast %cst_84 : f32 to vector<8x128xf32>
    %280 = arith.addf %279, %278 : vector<8x128xf32>
    %281 = arith.divf %279, %280 : vector<8x128xf32>
    %282 = math.tanh %276 : vector<8x128xf32>
    %283 = vector.shape_cast %2 : vector<1x128xi1> to vector<1x128xi1>
    %284 = vector.broadcast %283 : vector<1x128xi1> to vector<8x128xi1>
    %285 = arith.select %284, %281, %282 : vector<8x128xi1>, vector<8x128xf32>
    %c96_i32_85 = arith.constant 96 : i32
    %286 = tpu.dynamic_rotate %285 by %c96_i32_85 dim 1 : vector<8x128xf32>, i32 -> vector<8x128xf32>
    %c64_i32_86 = arith.constant 64 : i32
    %287 = tpu.dynamic_rotate %285 by %c64_i32_86 dim 1 : vector<8x128xf32>, i32 -> vector<8x128xf32>
    %c32_i32_87 = arith.constant 32 : i32
    %288 = tpu.dynamic_rotate %285 by %c32_i32_87 dim 1 : vector<8x128xf32>, i32 -> vector<8x128xf32>
    %289 = arith.mulf %286, %272 : vector<8x128xf32>
    %290 = arith.mulf %285, %288 : vector<8x128xf32>
    %291 = arith.addf %289, %290 : vector<8x128xf32>
    %292 = math.tanh %291 : vector<8x128xf32>
    %293 = arith.mulf %287, %292 : vector<8x128xf32>
    %294 = vector.extract_strided_slice %6 {offsets = [8, 0], sizes = [8, 128], strides = [1, 1]} : vector<64x128xi1> to vector<8x128xi1>
    %cst_88 = arith.constant 0.000000e+00 : f32
    %295 = vector.broadcast %cst_88 : f32 to vector<8x128xf32>
    %296 = arith.select %294, %293, %295 : vector<8x128xi1>, vector<8x128xf32>
    %297 = vector.extract_strided_slice %10 {offsets = [8, 0], sizes = [8, 128], strides = [1, 1]} : vector<64x128xi1> to vector<8x128xi1>
    %298 = arith.maximumf %270, %296 : vector<8x128xf32>
    %299 = arith.select %297, %298, %270 : vector<8x128xi1>, vector<8x128xf32>
    %300 = arith.select %294, %293, %271 : vector<8x128xi1>, vector<8x128xf32>
    %301 = arith.select %294, %291, %272 : vector<8x128xi1>, vector<8x128xf32>
    %302 = vector.extract_strided_slice %239 {offsets = [16, 0], sizes = [8, 128], strides = [1, 1]} : vector<64x128xf32> to vector<8x128xf32>
    %303 = arith.truncf %300 : vector<8x128xf32> to vector<8x128xbf16>
    %cst_89 = arith.constant dense<0.000000e+00> : vector<8x128xf32>
    %304 = tpu.matmul %303, %240, %cst_89 {dimension_numbers = #tpu.dot_dimension_numbers<[1], [0], [0], [1], [0, 0, 1, 1], [], []>} : vector<8x128xbf16>, vector<128x128xbf16>, vector<8x128xf32> -> vector<8x128xf32>
    %305 = arith.addf %302, %304 : vector<8x128xf32>
    %306 = arith.negf %305 : vector<8x128xf32>
    %307 = math.exp %306 : vector<8x128xf32>
    %cst_90 = arith.constant 1.000000e+00 : f32
    %308 = vector.broadcast %cst_90 : f32 to vector<8x128xf32>
    %309 = arith.addf %308, %307 : vector<8x128xf32>
    %310 = arith.divf %308, %309 : vector<8x128xf32>
    %311 = math.tanh %305 : vector<8x128xf32>
    %312 = vector.shape_cast %2 : vector<1x128xi1> to vector<1x128xi1>
    %313 = vector.broadcast %312 : vector<1x128xi1> to vector<8x128xi1>
    %314 = arith.select %313, %310, %311 : vector<8x128xi1>, vector<8x128xf32>
    %c96_i32_91 = arith.constant 96 : i32
    %315 = tpu.dynamic_rotate %314 by %c96_i32_91 dim 1 : vector<8x128xf32>, i32 -> vector<8x128xf32>
    %c64_i32_92 = arith.constant 64 : i32
    %316 = tpu.dynamic_rotate %314 by %c64_i32_92 dim 1 : vector<8x128xf32>, i32 -> vector<8x128xf32>
    %c32_i32_93 = arith.constant 32 : i32
    %317 = tpu.dynamic_rotate %314 by %c32_i32_93 dim 1 : vector<8x128xf32>, i32 -> vector<8x128xf32>
    %318 = arith.mulf %315, %301 : vector<8x128xf32>
    %319 = arith.mulf %314, %317 : vector<8x128xf32>
    %320 = arith.addf %318, %319 : vector<8x128xf32>
    %321 = math.tanh %320 : vector<8x128xf32>
    %322 = arith.mulf %316, %321 : vector<8x128xf32>
    %323 = vector.extract_strided_slice %6 {offsets = [16, 0], sizes = [8, 128], strides = [1, 1]} : vector<64x128xi1> to vector<8x128xi1>
    %cst_94 = arith.constant 0.000000e+00 : f32
    %324 = vector.broadcast %cst_94 : f32 to vector<8x128xf32>
    %325 = arith.select %323, %322, %324 : vector<8x128xi1>, vector<8x128xf32>
    %326 = vector.extract_strided_slice %10 {offsets = [16, 0], sizes = [8, 128], strides = [1, 1]} : vector<64x128xi1> to vector<8x128xi1>
    %327 = arith.maximumf %299, %325 : vector<8x128xf32>
    %328 = arith.select %326, %327, %299 : vector<8x128xi1>, vector<8x128xf32>
    %329 = arith.select %323, %322, %300 : vector<8x128xi1>, vector<8x128xf32>
    %330 = arith.select %323, %320, %301 : vector<8x128xi1>, vector<8x128xf32>
    %331 = vector.extract_strided_slice %239 {offsets = [24, 0], sizes = [8, 128], strides = [1, 1]} : vector<64x128xf32> to vector<8x128xf32>
    %332 = arith.truncf %329 : vector<8x128xf32> to vector<8x128xbf16>
    %cst_95 = arith.constant dense<0.000000e+00> : vector<8x128xf32>
    %333 = tpu.matmul %332, %240, %cst_95 {dimension_numbers = #tpu.dot_dimension_numbers<[1], [0], [0], [1], [0, 0, 1, 1], [], []>} : vector<8x128xbf16>, vector<128x128xbf16>, vector<8x128xf32> -> vector<8x128xf32>
    %334 = arith.addf %331, %333 : vector<8x128xf32>
    %335 = arith.negf %334 : vector<8x128xf32>
    %336 = math.exp %335 : vector<8x128xf32>
    %cst_96 = arith.constant 1.000000e+00 : f32
    %337 = vector.broadcast %cst_96 : f32 to vector<8x128xf32>
    %338 = arith.addf %337, %336 : vector<8x128xf32>
    %339 = arith.divf %337, %338 : vector<8x128xf32>
    %340 = math.tanh %334 : vector<8x128xf32>
    %341 = vector.shape_cast %2 : vector<1x128xi1> to vector<1x128xi1>
    %342 = vector.broadcast %341 : vector<1x128xi1> to vector<8x128xi1>
    %343 = arith.select %342, %339, %340 : vector<8x128xi1>, vector<8x128xf32>
    %c96_i32_97 = arith.constant 96 : i32
    %344 = tpu.dynamic_rotate %343 by %c96_i32_97 dim 1 : vector<8x128xf32>, i32 -> vector<8x128xf32>
    %c64_i32_98 = arith.constant 64 : i32
    %345 = tpu.dynamic_rotate %343 by %c64_i32_98 dim 1 : vector<8x128xf32>, i32 -> vector<8x128xf32>
    %c32_i32_99 = arith.constant 32 : i32
    %346 = tpu.dynamic_rotate %343 by %c32_i32_99 dim 1 : vector<8x128xf32>, i32 -> vector<8x128xf32>
    %347 = arith.mulf %344, %330 : vector<8x128xf32>
    %348 = arith.mulf %343, %346 : vector<8x128xf32>
    %349 = arith.addf %347, %348 : vector<8x128xf32>
    %350 = math.tanh %349 : vector<8x128xf32>
    %351 = arith.mulf %345, %350 : vector<8x128xf32>
    %352 = vector.extract_strided_slice %6 {offsets = [24, 0], sizes = [8, 128], strides = [1, 1]} : vector<64x128xi1> to vector<8x128xi1>
    %cst_100 = arith.constant 0.000000e+00 : f32
    %353 = vector.broadcast %cst_100 : f32 to vector<8x128xf32>
    %354 = arith.select %352, %351, %353 : vector<8x128xi1>, vector<8x128xf32>
    %355 = vector.extract_strided_slice %10 {offsets = [24, 0], sizes = [8, 128], strides = [1, 1]} : vector<64x128xi1> to vector<8x128xi1>
    %356 = arith.maximumf %328, %354 : vector<8x128xf32>
    %357 = arith.select %355, %356, %328 : vector<8x128xi1>, vector<8x128xf32>
    %358 = arith.select %352, %351, %329 : vector<8x128xi1>, vector<8x128xf32>
    %359 = arith.select %352, %349, %330 : vector<8x128xi1>, vector<8x128xf32>
    %360 = vector.extract_strided_slice %239 {offsets = [32, 0], sizes = [8, 128], strides = [1, 1]} : vector<64x128xf32> to vector<8x128xf32>
    %361 = arith.truncf %358 : vector<8x128xf32> to vector<8x128xbf16>
    %cst_101 = arith.constant dense<0.000000e+00> : vector<8x128xf32>
    %362 = tpu.matmul %361, %240, %cst_101 {dimension_numbers = #tpu.dot_dimension_numbers<[1], [0], [0], [1], [0, 0, 1, 1], [], []>} : vector<8x128xbf16>, vector<128x128xbf16>, vector<8x128xf32> -> vector<8x128xf32>
    %363 = arith.addf %360, %362 : vector<8x128xf32>
    %364 = arith.negf %363 : vector<8x128xf32>
    %365 = math.exp %364 : vector<8x128xf32>
    %cst_102 = arith.constant 1.000000e+00 : f32
    %366 = vector.broadcast %cst_102 : f32 to vector<8x128xf32>
    %367 = arith.addf %366, %365 : vector<8x128xf32>
    %368 = arith.divf %366, %367 : vector<8x128xf32>
    %369 = math.tanh %363 : vector<8x128xf32>
    %370 = vector.shape_cast %2 : vector<1x128xi1> to vector<1x128xi1>
    %371 = vector.broadcast %370 : vector<1x128xi1> to vector<8x128xi1>
    %372 = arith.select %371, %368, %369 : vector<8x128xi1>, vector<8x128xf32>
    %c96_i32_103 = arith.constant 96 : i32
    %373 = tpu.dynamic_rotate %372 by %c96_i32_103 dim 1 : vector<8x128xf32>, i32 -> vector<8x128xf32>
    %c64_i32_104 = arith.constant 64 : i32
    %374 = tpu.dynamic_rotate %372 by %c64_i32_104 dim 1 : vector<8x128xf32>, i32 -> vector<8x128xf32>
    %c32_i32_105 = arith.constant 32 : i32
    %375 = tpu.dynamic_rotate %372 by %c32_i32_105 dim 1 : vector<8x128xf32>, i32 -> vector<8x128xf32>
    %376 = arith.mulf %373, %359 : vector<8x128xf32>
    %377 = arith.mulf %372, %375 : vector<8x128xf32>
    %378 = arith.addf %376, %377 : vector<8x128xf32>
    %379 = math.tanh %378 : vector<8x128xf32>
    %380 = arith.mulf %374, %379 : vector<8x128xf32>
    %381 = vector.extract_strided_slice %6 {offsets = [32, 0], sizes = [8, 128], strides = [1, 1]} : vector<64x128xi1> to vector<8x128xi1>
    %cst_106 = arith.constant 0.000000e+00 : f32
    %382 = vector.broadcast %cst_106 : f32 to vector<8x128xf32>
    %383 = arith.select %381, %380, %382 : vector<8x128xi1>, vector<8x128xf32>
    %384 = vector.extract_strided_slice %10 {offsets = [32, 0], sizes = [8, 128], strides = [1, 1]} : vector<64x128xi1> to vector<8x128xi1>
    %385 = arith.maximumf %357, %383 : vector<8x128xf32>
    %386 = arith.select %384, %385, %357 : vector<8x128xi1>, vector<8x128xf32>
    %387 = arith.select %381, %380, %358 : vector<8x128xi1>, vector<8x128xf32>
    %388 = arith.select %381, %378, %359 : vector<8x128xi1>, vector<8x128xf32>
    %389 = vector.extract_strided_slice %239 {offsets = [40, 0], sizes = [8, 128], strides = [1, 1]} : vector<64x128xf32> to vector<8x128xf32>
    %390 = arith.truncf %387 : vector<8x128xf32> to vector<8x128xbf16>
    %cst_107 = arith.constant dense<0.000000e+00> : vector<8x128xf32>
    %391 = tpu.matmul %390, %240, %cst_107 {dimension_numbers = #tpu.dot_dimension_numbers<[1], [0], [0], [1], [0, 0, 1, 1], [], []>} : vector<8x128xbf16>, vector<128x128xbf16>, vector<8x128xf32> -> vector<8x128xf32>
    %392 = arith.addf %389, %391 : vector<8x128xf32>
    %393 = arith.negf %392 : vector<8x128xf32>
    %394 = math.exp %393 : vector<8x128xf32>
    %cst_108 = arith.constant 1.000000e+00 : f32
    %395 = vector.broadcast %cst_108 : f32 to vector<8x128xf32>
    %396 = arith.addf %395, %394 : vector<8x128xf32>
    %397 = arith.divf %395, %396 : vector<8x128xf32>
    %398 = math.tanh %392 : vector<8x128xf32>
    %399 = vector.shape_cast %2 : vector<1x128xi1> to vector<1x128xi1>
    %400 = vector.broadcast %399 : vector<1x128xi1> to vector<8x128xi1>
    %401 = arith.select %400, %397, %398 : vector<8x128xi1>, vector<8x128xf32>
    %c96_i32_109 = arith.constant 96 : i32
    %402 = tpu.dynamic_rotate %401 by %c96_i32_109 dim 1 : vector<8x128xf32>, i32 -> vector<8x128xf32>
    %c64_i32_110 = arith.constant 64 : i32
    %403 = tpu.dynamic_rotate %401 by %c64_i32_110 dim 1 : vector<8x128xf32>, i32 -> vector<8x128xf32>
    %c32_i32_111 = arith.constant 32 : i32
    %404 = tpu.dynamic_rotate %401 by %c32_i32_111 dim 1 : vector<8x128xf32>, i32 -> vector<8x128xf32>
    %405 = arith.mulf %402, %388 : vector<8x128xf32>
    %406 = arith.mulf %401, %404 : vector<8x128xf32>
    %407 = arith.addf %405, %406 : vector<8x128xf32>
    %408 = math.tanh %407 : vector<8x128xf32>
    %409 = arith.mulf %403, %408 : vector<8x128xf32>
    %410 = vector.extract_strided_slice %6 {offsets = [40, 0], sizes = [8, 128], strides = [1, 1]} : vector<64x128xi1> to vector<8x128xi1>
    %cst_112 = arith.constant 0.000000e+00 : f32
    %411 = vector.broadcast %cst_112 : f32 to vector<8x128xf32>
    %412 = arith.select %410, %409, %411 : vector<8x128xi1>, vector<8x128xf32>
    %413 = vector.extract_strided_slice %10 {offsets = [40, 0], sizes = [8, 128], strides = [1, 1]} : vector<64x128xi1> to vector<8x128xi1>
    %414 = arith.maximumf %386, %412 : vector<8x128xf32>
    %415 = arith.select %413, %414, %386 : vector<8x128xi1>, vector<8x128xf32>
    %416 = arith.select %410, %409, %387 : vector<8x128xi1>, vector<8x128xf32>
    %417 = arith.select %410, %407, %388 : vector<8x128xi1>, vector<8x128xf32>
    %418 = vector.extract_strided_slice %239 {offsets = [48, 0], sizes = [8, 128], strides = [1, 1]} : vector<64x128xf32> to vector<8x128xf32>
    %419 = arith.truncf %416 : vector<8x128xf32> to vector<8x128xbf16>
    %cst_113 = arith.constant dense<0.000000e+00> : vector<8x128xf32>
    %420 = tpu.matmul %419, %240, %cst_113 {dimension_numbers = #tpu.dot_dimension_numbers<[1], [0], [0], [1], [0, 0, 1, 1], [], []>} : vector<8x128xbf16>, vector<128x128xbf16>, vector<8x128xf32> -> vector<8x128xf32>
    %421 = arith.addf %418, %420 : vector<8x128xf32>
    %422 = arith.negf %421 : vector<8x128xf32>
    %423 = math.exp %422 : vector<8x128xf32>
    %cst_114 = arith.constant 1.000000e+00 : f32
    %424 = vector.broadcast %cst_114 : f32 to vector<8x128xf32>
    %425 = arith.addf %424, %423 : vector<8x128xf32>
    %426 = arith.divf %424, %425 : vector<8x128xf32>
    %427 = math.tanh %421 : vector<8x128xf32>
    %428 = vector.shape_cast %2 : vector<1x128xi1> to vector<1x128xi1>
    %429 = vector.broadcast %428 : vector<1x128xi1> to vector<8x128xi1>
    %430 = arith.select %429, %426, %427 : vector<8x128xi1>, vector<8x128xf32>
    %c96_i32_115 = arith.constant 96 : i32
    %431 = tpu.dynamic_rotate %430 by %c96_i32_115 dim 1 : vector<8x128xf32>, i32 -> vector<8x128xf32>
    %c64_i32_116 = arith.constant 64 : i32
    %432 = tpu.dynamic_rotate %430 by %c64_i32_116 dim 1 : vector<8x128xf32>, i32 -> vector<8x128xf32>
    %c32_i32_117 = arith.constant 32 : i32
    %433 = tpu.dynamic_rotate %430 by %c32_i32_117 dim 1 : vector<8x128xf32>, i32 -> vector<8x128xf32>
    %434 = arith.mulf %431, %417 : vector<8x128xf32>
    %435 = arith.mulf %430, %433 : vector<8x128xf32>
    %436 = arith.addf %434, %435 : vector<8x128xf32>
    %437 = math.tanh %436 : vector<8x128xf32>
    %438 = arith.mulf %432, %437 : vector<8x128xf32>
    %439 = vector.extract_strided_slice %6 {offsets = [48, 0], sizes = [8, 128], strides = [1, 1]} : vector<64x128xi1> to vector<8x128xi1>
    %cst_118 = arith.constant 0.000000e+00 : f32
    %440 = vector.broadcast %cst_118 : f32 to vector<8x128xf32>
    %441 = arith.select %439, %438, %440 : vector<8x128xi1>, vector<8x128xf32>
    %442 = vector.extract_strided_slice %10 {offsets = [48, 0], sizes = [8, 128], strides = [1, 1]} : vector<64x128xi1> to vector<8x128xi1>
    %443 = arith.maximumf %415, %441 : vector<8x128xf32>
    %444 = arith.select %442, %443, %415 : vector<8x128xi1>, vector<8x128xf32>
    %445 = arith.select %439, %438, %416 : vector<8x128xi1>, vector<8x128xf32>
    %446 = arith.select %439, %436, %417 : vector<8x128xi1>, vector<8x128xf32>
    %447 = vector.extract_strided_slice %239 {offsets = [56, 0], sizes = [8, 128], strides = [1, 1]} : vector<64x128xf32> to vector<8x128xf32>
    %448 = arith.truncf %445 : vector<8x128xf32> to vector<8x128xbf16>
    %cst_119 = arith.constant dense<0.000000e+00> : vector<8x128xf32>
    %449 = tpu.matmul %448, %240, %cst_119 {dimension_numbers = #tpu.dot_dimension_numbers<[1], [0], [0], [1], [0, 0, 1, 1], [], []>} : vector<8x128xbf16>, vector<128x128xbf16>, vector<8x128xf32> -> vector<8x128xf32>
    %450 = arith.addf %447, %449 : vector<8x128xf32>
    %451 = arith.negf %450 : vector<8x128xf32>
    %452 = math.exp %451 : vector<8x128xf32>
    %cst_120 = arith.constant 1.000000e+00 : f32
    %453 = vector.broadcast %cst_120 : f32 to vector<8x128xf32>
    %454 = arith.addf %453, %452 : vector<8x128xf32>
    %455 = arith.divf %453, %454 : vector<8x128xf32>
    %456 = math.tanh %450 : vector<8x128xf32>
    %457 = vector.shape_cast %2 : vector<1x128xi1> to vector<1x128xi1>
    %458 = vector.broadcast %457 : vector<1x128xi1> to vector<8x128xi1>
    %459 = arith.select %458, %455, %456 : vector<8x128xi1>, vector<8x128xf32>
    %c96_i32_121 = arith.constant 96 : i32
    %460 = tpu.dynamic_rotate %459 by %c96_i32_121 dim 1 : vector<8x128xf32>, i32 -> vector<8x128xf32>
    %c64_i32_122 = arith.constant 64 : i32
    %461 = tpu.dynamic_rotate %459 by %c64_i32_122 dim 1 : vector<8x128xf32>, i32 -> vector<8x128xf32>
    %c32_i32_123 = arith.constant 32 : i32
    %462 = tpu.dynamic_rotate %459 by %c32_i32_123 dim 1 : vector<8x128xf32>, i32 -> vector<8x128xf32>
    %463 = arith.mulf %460, %446 : vector<8x128xf32>
    %464 = arith.mulf %459, %462 : vector<8x128xf32>
    %465 = arith.addf %463, %464 : vector<8x128xf32>
    %466 = math.tanh %465 : vector<8x128xf32>
    %467 = arith.mulf %461, %466 : vector<8x128xf32>
    %468 = vector.extract_strided_slice %6 {offsets = [56, 0], sizes = [8, 128], strides = [1, 1]} : vector<64x128xi1> to vector<8x128xi1>
    %cst_124 = arith.constant 0.000000e+00 : f32
    %469 = vector.broadcast %cst_124 : f32 to vector<8x128xf32>
    %470 = arith.select %468, %467, %469 : vector<8x128xi1>, vector<8x128xf32>
    %471 = vector.extract_strided_slice %10 {offsets = [56, 0], sizes = [8, 128], strides = [1, 1]} : vector<64x128xi1> to vector<8x128xi1>
    %472 = arith.maximumf %444, %470 : vector<8x128xf32>
    %473 = arith.select %471, %472, %444 : vector<8x128xi1>, vector<8x128xf32>
    %cst_125 = arith.constant -1.000000e+29 : f32
    %474 = vector.broadcast %cst_125 : f32 to vector<8x128xf32>
    %475 = arith.cmpf ogt, %473, %474 : vector<8x128xf32>
    %cst_126 = arith.constant 0.000000e+00 : f32
    %476 = vector.broadcast %cst_126 : f32 to vector<8x128xf32>
    %477 = arith.select %475, %473, %476 : vector<8x128xi1>, vector<8x128xf32>
    %c0_127 = arith.constant 0 : index
    %c0_128 = arith.constant 0 : index
    %478 = vector.load %arg11[%c0_127, %c0_128] : memref<128x3xf32, #tpu.memory_space<vmem>>, vector<128x3xf32>
    %cst_129 = arith.constant dense<0.000000e+00> : vector<8x3xf32>
    %479 = tpu.matmul %477, %478, %cst_129 {dimension_numbers = #tpu.dot_dimension_numbers<[1], [0], [0], [1], [0, 0, 1, 1], [], []>} : vector<8x128xf32>, vector<128x3xf32>, vector<8x3xf32> -> vector<8x3xf32>
    %c0_130 = arith.constant 0 : index
    %c0_131 = arith.constant 0 : index
    %480 = vector.load %arg12[%c0_130, %c0_131] : memref<1x3xf32, #tpu.memory_space<vmem>>, vector<1x3xf32>
    %481 = vector.broadcast %480 : vector<1x3xf32> to vector<8x3xf32>
    %482 = arith.addf %479, %481 : vector<8x3xf32>
    %c0_132 = arith.constant 0 : index
    %c0_133 = arith.constant 0 : index
    %483 = vector.load %arg13[%c0_132, %c0_133] : memref<8x3xf32, #tpu.memory_space<vmem>>, vector<8x3xf32>
    tpu.vector_store %arg13[%c0_132, %c0_133], %482 {strides = array<i32>} : memref<8x3xf32, #tpu.memory_space<vmem>>, vector<8x3xf32>,
    return
  }
  func.func @transform_0(%arg0: i32) -> (i32, i32, i32) {
    %c0_i32 = arith.constant 0 : i32
    %c0_i32_0 = arith.constant 0 : i32
    %c0_i32_1 = arith.constant 0 : i32
    return %arg0, %c0_i32, %c0_i32_0 : i32, i32, i32
  }
  func.func @transform_1(%arg0: i32) -> (i32, i32, i32) {
    %c0_i32 = arith.constant 0 : i32
    %c0_i32_0 = arith.constant 0 : i32
    %c0_i32_1 = arith.constant 0 : i32
    return %arg0, %c0_i32, %c0_i32_0 : i32, i32, i32
  }
  func.func @transform_2(%arg0: i32) -> (i32, i32, i32) {
    %c0_i32 = arith.constant 0 : i32
    %c0_i32_0 = arith.constant 0 : i32
    %c0_i32_1 = arith.constant 0 : i32
    return %arg0, %c0_i32, %c0_i32_0 : i32, i32, i32
  }
  func.func @transform_3(%arg0: i32) -> (i32, i32) {
    %c0_i32 = arith.constant 0 : i32
    %c0_i32_0 = arith.constant 0 : i32
    %c0_i32_1 = arith.constant 0 : i32
    return %c0_i32, %c0_i32_0 : i32, i32
  }
  func.func @transform_4(%arg0: i32) -> (i32, i32) {
    %c0_i32 = arith.constant 0 : i32
    %c0_i32_0 = arith.constant 0 : i32
    %c0_i32_1 = arith.constant 0 : i32
    return %c0_i32, %c0_i32_0 : i32, i32
  }
  func.func @transform_5(%arg0: i32) -> (i32, i32) {
    %c0_i32 = arith.constant 0 : i32
    %c0_i32_0 = arith.constant 0 : i32
    %c0_i32_1 = arith.constant 0 : i32
    return %c0_i32, %c0_i32_0 : i32, i32
  }
  func.func @transform_6(%arg0: i32) -> (i32, i32) {
    %c0_i32 = arith.constant 0 : i32
    %c0_i32_0 = arith.constant 0 : i32
    %c0_i32_1 = arith.constant 0 : i32
    return %c0_i32, %c0_i32_0 : i32, i32
  }
  func.func @transform_7(%arg0: i32) -> (i32, i32) {
    %c0_i32 = arith.constant 0 : i32
    %c0_i32_0 = arith.constant 0 : i32
    %c0_i32_1 = arith.constant 0 : i32
    return %c0_i32, %c0_i32_0 : i32, i32
  }
  func.func @transform_8(%arg0: i32) -> (i32, i32) {
    %c0_i32 = arith.constant 0 : i32
    %c0_i32_0 = arith.constant 0 : i32
    %c0_i32_1 = arith.constant 0 : i32
    return %c0_i32, %c0_i32_0 : i32, i32
  }
  func.func @transform_9(%arg0: i32) -> (i32, i32) {
    %c0_i32 = arith.constant 0 : i32
    %c0_i32_0 = arith.constant 0 : i32
    %c0_i32_1 = arith.constant 0 : i32
    return %c0_i32, %c0_i32_0 : i32, i32
  }
  func.func @transform_10(%arg0: i32) -> (i32, i32) {
    %c0_i32 = arith.constant 0 : i32
    %c0_i32_0 = arith.constant 0 : i32
    %c0_i32_1 = arith.constant 0 : i32
    return %c0_i32, %c0_i32_0 : i32, i32
  }
  func.func @transform_11(%arg0: i32) -> (i32, i32) {
    %c0_i32 = arith.constant 0 : i32
    %c0_i32_0 = arith.constant 0 : i32
    %c0_i32_1 = arith.constant 0 : i32
    return %c0_i32, %c0_i32_0 : i32, i32
  }
  func.func @transform_12(%arg0: i32) -> (i32, i32) {
    %c0_i32 = arith.constant 0 : i32
    %c0_i32_0 = arith.constant 0 : i32
    return %arg0, %c0_i32 : i32, i32
  }
}

</mosaic_0001>

<bundles_post_ra>
// kernel: lstm_model_forward.1
= control target key start
LH: loop header
LB: loop body
LE: loop exit
PB: predicated region body
PF: predicated region fallthrough
CT: control target
= control target key end

     0   :  { %v2655_v0 = vmov 0.0   ;;  %vm2656_vm0 = vmmov 0   ;;  %vm128_vm1 = vcmask 523264   ;;  %v2657_v19 = vmov 0   ;;  %s2658_s24 = smov 64   ;;  %s2659_s25 = smov 96   ;;  %s3615_s4 = inlined_call_operand.vmem [shape: bf16[128,128], index: 4, kind: input, shape index: {}]   ;;  %s3616_s3 = inlined_call_operand.vmem [shape: bf16[64,128], index: 3, kind: input, shape index: {}]   ;;  %s3617_s0 = inlined_call_operand.vmem [shape: f32[1,64,64], index: 0, kind: input, shape index: {}]   ;;  %s3618_s5 = inlined_call_operand.vmem [shape: f32[1,128], index: 5, kind: input, shape index: {}]   ;;  %s3619_s1 = inlined_call_operand.vmem [shape: f32[1,64,128], index: 1, kind: input, shape index: {}]   ;;  %s3620_s7 = inlined_call_operand.vmem [shape: bf16[128,128], index: 7, kind: input, shape index: {}]   ;;  %s3621_s6 = inlined_call_operand.vmem [shape: bf16[128,128], index: 6, kind: input, shape index: {}]   ;;  %s3622_s8 = inlined_call_operand.vmem [shape: bf16[128,128], index: 8, kind: input, shape index: {}]   ;;  %s3623_s9 = inlined_call_operand.vmem [shape: f32[1,128], index: 9, kind: input, shape index: {}]   ;;  %s3624_s2 = inlined_call_operand.vmem [shape: f32[1,64,128], index: 2, kind: input, shape index: {}]   ;;  %s3625_s10 = inlined_call_operand.vmem [shape: f32[128,3], index: 10, kind: input, shape index: {}]   ;;  %s3626_s11 = inlined_call_operand.vmem [shape: f32[1,3], index: 11, kind: input, shape index: {}]   ;;  %s3627_s12 = inlined_call_operand.vmem [shape: f32[8,3], index: 12, kind: output, shape index: {}]  }
   0x1   :  { %2049 = vmatprep.subr.bf16.mxu1 %v2655_v0  ;;  %v2731_v1 = vld [vmem:[%s3615_s4] sm:$0xff]   ;;  %2065 = vmatprep.mubr.msk.bf16.mxu1 %vm2656_vm0, %v2655_v0  ;;  %v2739_v2 = vld [vmem:[%s3615_s4 + $0x8] sm:$0xff]   ;;  %v2752_v5 = vld [vmem:[%s3615_s4 + $0x10] sm:$0xff]   ;;  %v42_v34 = vlaneseq }
   0x2   :  { %2050 = vmatpush3.bf16.msra.mxu1 %v2731_v1  ;;  %v2494_v3 = vld [vmem:[%s3616_s3] sm:$0xff]   ;;  %v2496_v4 = vld [vmem:[%s3616_s3 + $0x8] sm:$0xff]   ;;  %v2498_v6 = vld [vmem:[%s3616_s3 + $0x10] sm:$0xff]  }
   0x3   :  { %2051 = vmatprep.subr.bf16.mxu1 %v2655_v0  ;;  %2033 = vmatprep.subr.bf16.mxu0 %v2494_v3  ;;  %v2761_v7 = vld [vmem:[%s3615_s4 + $0x18] sm:$0xff]   ;;  %v77_v8 = vld [vmem:[%s3617_s0] sm:$0xff]  ;;  %v78_v9 = vld [vmem:[%s3617_s0 + $0x8] sm:$0xff]  ;;  %v2860_v35 = vand.u32 127, %v42_v34 }
   0x4   :  { %2034 = vmatpush3.bf16.msra.mxu0 %v2494_v3  ;;  %v2500_v10 = vld [vmem:[%s3616_s3 + $0x18] sm:$0xff]   ;;  %v85_v11 = vpack.c.bf16 %v78_v9, %v77_v8  ;;  %v2779_v12 = vld [vmem:[%s3615_s4 + $0x20] sm:$0xff]   ;;  %v79_v13 = vld [vmem:[%s3617_s0 + $0x10] sm:$0xff] }
   0x5   :  { %2035 = vmatprep.subr.bf16.mxu0 %v2496_v4  ;;  %v80_v14 = vld [vmem:[%s3617_s0 + $0x18] sm:$0xff]  ;;  %v2792_v16 = vld [vmem:[%s3615_s4 + $0x28] sm:$0xff]   ;;  %v2801_v17 = vld [vmem:[%s3615_s4 + $0x30] sm:$0xff]   ;;  %vm44_vm2 = vcmp.lt.s32.totalorder %v2860_v35, 96 }
   0x6   :  { %2052 = vmatpush3.bf16.msra.mxu1 %v2739_v2  ;;  %2041 = vmatprep.mubr.msk.bf16.mxu0 %vm128_vm1, %v85_v11  ;;  %v86_v15 = vpack.c.bf16 %v80_v14, %v79_v13  ;;  %v2810_v18 = vld [vmem:[%s3615_s4 + $0x38] sm:$0xff]   ;;  %v2857_v24 = vld [vmem:[%s3618_s5] ss:$0 sm:$0xff]  ;;  %v82_v37 = vld [vmem:[%s3617_s0 + $0x28] sm:$0xff] }
   0x7   :  { %2053 = vmatprep.subr.bf16.mxu1 %v2655_v0  ;;  %v81_v36 = vld [vmem:[%s3617_s0 + $0x20] sm:$0xff]  ;;  %v83_v39 = vld [vmem:[%s3617_s0 + $0x30] sm:$0xff]  ;;  %v84_v40 = vld [vmem:[%s3617_s0 + $0x38] sm:$0xff]  ;;  %s2660_s0 = smov 32  }
   0x8   :  { %2036 = vmatpush3.bf16.msra.mxu0 %v2496_v4  ;;  %v87_v38 = vpack.c.bf16 %v82_v37, %v81_v36  ;;  %v88_v42 = vpack.c.bf16 %v84_v40, %v83_v39  ;;  %v2887_v50 = vld [vmem:[%s3619_s1] sm:$0xff]  ;;  %v2939_v14 = vld [vmem:[%s3619_s1 + $0x8] sm:$0xff]  ;;  %v1665_v35 = vld [vmem:[%s3625_s10 + $0x70] sm:$0xff] }
   0x9   :  { %2037 = vmatprep.subr.bf16.mxu0 %v2498_v6  ;;  %vm53_vm3 = vcmp.gt.f32.partialorder %v2887_v50, 0.0  ;;  %vm54_vm5 = vcmp.gt.f32.partialorder %v2939_v14, 0.0 }
   0xa   :  { %2054 = vmatpush3.bf16.msra.mxu1 %v2752_v5  ;;  %vm2895_vm4 = vmpackc.low %vm53_vm3, %vm53_vm3 }
   0xb   :  { %2055 = vmatprep.subr.bf16.mxu1 %v2655_v0  ;;  %vm1795_vm15 = vmpackc.low %vm53_vm3, %vm54_vm5 }
   0xc   :  { %2038 = vmatpush3.bf16.msra.mxu0 %v2498_v6 }
   0xd   :  { %2039 = vmatprep.subr.bf16.mxu0 %v2500_v10 }
   0xe   :  { %2056 = vmatpush3.bf16.msra.mxu1 %v2761_v7 }
   0xf   :  { %2057 = vmatprep.subr.bf16.mxu1 %v2655_v0 }
  0x10   :  { %2040 = vmatpush3.bf16.msra.mxu0 %v2500_v10 }
  0x11   :  { %2069 = vmatprep.subr.bf16.mxu0 %v2655_v0 }
  0x12   :  { %2058 = vmatpush3.bf16.msra.mxu1 %v2779_v12 }
  0x13   :  { %2059 = vmatprep.subr.bf16.mxu1 %v2655_v0  ;;  %2042 = vmatmul.mubr.msk.bf16.vlgmr.msra.gmra.mrb[0].mxu0 %vm128_vm1, %v86_v15 }
  0x14   :  { %2070 = vmatpush3.bf16.msra.mxu0 %v2731_v1  ;;  %2045 = vmatprep.mubr.msk.bf16.mxu0 %vm128_vm1, %v87_v38 }
  0x15   :  { %2071 = vmatprep.subr.bf16.mxu0 %v2655_v0 }
  0x16   :  { %2060 = vmatpush3.bf16.msra.mxu1 %v2792_v16 }
  0x17   :  { %2061 = vmatprep.subr.bf16.mxu1 %v2655_v0 }
  0x18   :  { %2072 = vmatpush3.bf16.msra.mxu0 %v2739_v2 }
  0x19   :  { %2073 = vmatprep.subr.bf16.mxu0 %v2655_v0 }
  0x1a   :  { %2062 = vmatpush3.bf16.msra.mxu1 %v2801_v17 }
  0x1b   :  { %2063 = vmatprep.subr.bf16.mxu1 %v2655_v0  ;;  %2046 = vmatmul.mubr.msk.bf16.gmra.mrb[4].mxu0 %vm128_vm1, %v88_v42  ;;  %vm1806_vm1 = vmpackc.low %vm54_vm5, %vm53_vm3 }
  0x1c   :  { %2074 = vmatpush3.bf16.msra.mxu0 %v2752_v5  ;;  %2085 = vmatprep.mubr.msk.bf16.mxu0 %vm2656_vm0, %v2655_v0 }
  0x1d   :  { %2075 = vmatprep.subr.bf16.mxu0 %v2655_v0 }
  0x1e   :  { %2064 = vmatpush3.bf16.msra.mxu1 %v2810_v18 }
  0x1f   :  { %2089 = vmatprep.subr.bf16.mxu1 %v2655_v0 }
  0x20   :  { %2076 = vmatpush3.bf16.msra.mxu0 %v2761_v7 }
  0x21   :  { %2066 = vmatmul.mubr.bf16.vlgmr.msra.gmra.mrb[0].mxu1 %v2657_v19  ;;  %2077 = vmatprep.subr.bf16.mxu0 %v2655_v0 }
  0x22   :  { %2090 = vmatpush3.bf16.msra.mxu1 %v2731_v1  ;;  %2105 = vmatprep.mubr.msk.bf16.mxu1 %vm2656_vm0, %v2655_v0 }
  0x23   :  { %2091 = vmatprep.subr.bf16.mxu1 %v2655_v0 }
  0x24   :  { %2078 = vmatpush3.bf16.msra.mxu0 %v2779_v12 }
  0x25   :  { %2079 = vmatprep.subr.bf16.mxu0 %v2655_v0 }
  0x26   :  { %2092 = vmatpush3.bf16.msra.mxu1 %v2739_v2 }
  0x27   :  { %2093 = vmatprep.subr.bf16.mxu1 %v2655_v0 }
  0x28   :  { %2080 = vmatpush3.bf16.msra.mxu0 %v2792_v16 }
  0x29   :  { %2081 = vmatprep.subr.bf16.mxu0 %v2655_v0 }
  0x2a   :  { %2094 = vmatpush3.bf16.msra.mxu1 %v2752_v5 }
  0x2b   :  { %2095 = vmatprep.subr.bf16.mxu1 %v2655_v0 }
  0x2c   :  { %2082 = vmatpush3.bf16.msra.mxu0 %v2801_v17 }
  0x2d   :  { %2083 = vmatprep.subr.bf16.mxu0 %v2655_v0 }
  0x2e   :  { %2096 = vmatpush3.bf16.msra.mxu1 %v2761_v7 }
  0x2f   :  { %2097 = vmatprep.subr.bf16.mxu1 %v2655_v0 }
  0x30   :  { %2084 = vmatpush3.bf16.msra.mxu0 %v2810_v18 }
  0x31   :  { %2109 = vmatprep.subr.bf16.mxu0 %v2655_v0 }
  0x32   :  { %2098 = vmatpush3.bf16.msra.mxu1 %v2779_v12 }
  0x33   :  { %2099 = vmatprep.subr.bf16.mxu1 %v2655_v0 }
  0x36   :  { %2100 = vmatpush3.bf16.msra.mxu1 %v2792_v16 }
  0x37   :  { %2101 = vmatprep.subr.bf16.mxu1 %v2655_v0 }
  0x3a   :  { %2102 = vmatpush3.bf16.msra.mxu1 %v2801_v17 }
  0x3b   :  { %2103 = vmatprep.subr.bf16.mxu1 %v2655_v0 }
  0x3e   :  { %2104 = vmatpush3.bf16.msra.mxu1 %v2810_v18 }
  0x3f   :  { %2129 = vmatprep.subr.bf16.mxu1 %v2655_v0 }
  0xe6   :  { %v2848_v20 = vpop.f32.mrb[0].mxu0 }
  0xe7   :  { %v175_v21 = vpop.f32.mrb[1].mxu0  ;;  %v184_v36 = vadd.f32 %v2848_v20, %v2857_v24  ;;  %v2982_v20 = vld [vmem:[%s3619_s1 + $0x10] sm:$0xff] }
  0xe8   :  { %v2850_v22 = vpop.f32.mrb[2].mxu0  ;;  %v176_v25 = vadd.f32 %v2857_v24, %v175_v21  ;;  %vm55_vm6 = vcmp.gt.f32.partialorder %v2982_v20, 0.0 }
  0xe9   :  { %v2852_v23 = vpop.f32.mrb[3].mxu0 }
  0xea   :  { %v179_v60 = vadd.f32 %v2857_v24, %v2852_v23 }
  0xee   :  { %v2921_v56 = vpop.f32.mrb[4].mxu0 }
  0xef   :  { %v2923_v57 = vpop.f32.mrb[5].mxu0 }
  0xf0   :  { %v2925_v58 = vpop.f32.mrb[6].mxu0 }
  0xf1   :  { %v2927_v59 = vpop.f32.mrb[7].mxu0 }
  0xf4   :  { %v304_v26 = vpop.f32.mrb[0].mxu1 }
  0xf5   :  { %v310_v27 = vadd.f32 %v304_v26, %v176_v25  ;;  %v2067_v28 = vpop.f32.mrb[1].mxu1 }
  0xf6   :  { %v307_v29 = vpop.f32.mrb[2].mxu1 }
  0xf7   :  { %v1767_v30 = vmul.f32 -1.442695, %v310_v27  ;;  %v2068_v31 = vpop.f32.mrb[3].mxu1 }
  0xf9   :  { %2527 = vpow2.f32 %v1767_v30 }
  0xfa   :  { %2529 = vtanh.f32 %v310_v27 }
 0x103   :  { %v2528_v32 = vpop.eup %2527 }
 0x104   :  { %v314_v33 = vadd.f32 1.0, %v2528_v32  ;;  %v2530_v41 = vpop.eup %2529 }
 0x106   :  { %2531 = vrcp.f32 %v314_v33 }
 0x110   :  { %v2532_v43 = vpop.eup %2531 }
 0x111   :  { %v320_v44 = vsel %vm44_vm2, %v2532_v43, %v2530_v41 }
 0x112   :  { %323 = vrot.lane.b32.xlu1 %v320_v44, %s2658_s24  ;;  %321 = vrot.lane.b32.xlu0 %v320_v44, %s2659_s25 }
 0x116   :  { %325 = vrot.lane.b32.xlu0 %v320_v44, %s2660_s0 }
 0x184   :  { %v322_v45 = vpop.permute.xlu0 %321  ;;  %v324_v52 = vpop.permute.xlu1 %323 }
 0x185   :  { %v327_v47 = vmul.f32 0.0, %v322_v45 }
 0x188   :  { %v326_v46 = vpop.permute.xlu0 %325 }
 0x189   :  { %v328_v48 = vmul.f32 %v326_v46, %v320_v44 }
 0x18b   :  { %v329_v49 = vadd.f32 %v328_v48, %v327_v47 }
 0x18d   :  { %2533 = vtanh.f32 %v329_v49  ;;  %v333_v21 = vsel %vm53_vm3, %v329_v49, 0.0 }
 0x197   :  { %v2534_v51 = vpop.eup %2533 }
 0x198   :  { %v2889_v53 = vmul.f32 %v2534_v51, %v324_v52 }
 0x19a   :  { %v1769_v55 = vpack.c.bf16 %v2889_v53, %v2889_v53  ;;  %v332_v32 = vsel %vm53_vm3, %v2889_v53, 0.0 }
 0x19c   :  { %2086 = vmatmul.mubr.msk.bf16.vlgmr.msra.gmra.mrb[8].mxu0 %vm2895_vm4, %v1769_v55 }
 0x19d   :  { %2110 = vmatpush3.bf16.msra.mxu0 %v2731_v1  ;;  %2125 = vmatprep.mubr.msk.bf16.mxu0 %vm2656_vm0, %v2655_v0 }
 0x19e   :  { %2111 = vmatprep.subr.bf16.mxu0 %v2655_v0 }
 0x1a1   :  { %2112 = vmatpush3.bf16.msra.mxu0 %v2739_v2 }
 0x1a2   :  { %2113 = vmatprep.subr.bf16.mxu0 %v2655_v0 }
 0x1a5   :  { %2114 = vmatpush3.bf16.msra.mxu0 %v2752_v5 }
 0x1a6   :  { %2115 = vmatprep.subr.bf16.mxu0 %v2655_v0 }
 0x1a9   :  { %2116 = vmatpush3.bf16.msra.mxu0 %v2761_v7 }
 0x1aa   :  { %2117 = vmatprep.subr.bf16.mxu0 %v2655_v0 }
 0x1ad   :  { %2118 = vmatpush3.bf16.msra.mxu0 %v2779_v12 }
 0x1ae   :  { %2119 = vmatprep.subr.bf16.mxu0 %v2655_v0 }
 0x1b1   :  { %2120 = vmatpush3.bf16.msra.mxu0 %v2792_v16 }
 0x1b2   :  { %2121 = vmatprep.subr.bf16.mxu0 %v2655_v0 }
 0x1b5   :  { %2122 = vmatpush3.bf16.msra.mxu0 %v2801_v17 }
 0x1b6   :  { %2123 = vmatprep.subr.bf16.mxu0 %v2655_v0 }
 0x1b9   :  { %2124 = vmatpush3.bf16.msra.mxu0 %v2810_v18 }
 0x1ba   :  { %2149 = vmatprep.subr.bf16.mxu0 %v2655_v0 }
 0x26f   :  { %v369_v61 = vpop.f32.mrb[8].mxu0 }
 0x270   :  { %v375_v62 = vadd.f32 %v369_v61, %v179_v60  ;;  %v2087_v63 = vpop.f32.mrb[9].mxu0 }
 0x271   :  { %v372_v3 = vpop.f32.mrb[10].mxu0 }
 0x272   :  { %v1771_v4 = vmul.f32 -1.442695, %v375_v62  ;;  %v2088_v6 = vpop.f32.mrb[11].mxu0 }
 0x273   :  { %v187_v6 = vadd.f32 %v2850_v22, %v2857_v24  ;;  %v3020_v22 = vld [vmem:[%s3619_s1 + $0x18] sm:$0xff] }
 0x274   :  { %2535 = vpow2.f32 %v1771_v4  ;;  %vm56_vm7 = vcmp.gt.f32.partialorder %v3020_v22, 0.0 }
 0x275   :  { %2537 = vtanh.f32 %v375_v62  ;;  %vm1792_vm14 = vmpackc.low %vm55_vm6, %vm56_vm7 }
 0x27e   :  { %v2536_v8 = vpop.eup %2535 }
 0x27f   :  { %v379_v9 = vadd.f32 1.0, %v2536_v8  ;;  %v2538_v10 = vpop.eup %2537 }
 0x281   :  { %2539 = vrcp.f32 %v379_v9 }
 0x28b   :  { %v2540_v11 = vpop.eup %2539 }
 0x28c   :  { %v383_v13 = vsel %vm44_vm2, %v2540_v11, %v2538_v10 }
 0x28d   :  { %388 = vrot.lane.b32.xlu0 %v383_v13, %s2660_s0  ;;  %384 = vrot.lane.b32.xlu1 %v383_v13, %s2659_s25 }
 0x291   :  { %386 = vrot.lane.b32.xlu1 %v383_v13, %s2658_s24 }
 0x2ff   :  { %v389_v15 = vpop.permute.xlu0 %388  ;;  %v385_v23 = vpop.permute.xlu1 %384 }
 0x300   :  { %v391_v25 = vmul.f32 %v389_v15, %v383_v13  ;;  %v390_v26 = vmul.f32 %v385_v23, %v333_v21 }
 0x302   :  { %v392_v27 = vadd.f32 %v391_v25, %v390_v26 }
 0x303   :  { %v387_v30 = vpop.permute.xlu1 %386 }
 0x304   :  { %2541 = vtanh.f32 %v392_v27  ;;  %v397_v28 = vsel %vm54_vm5, %v392_v27, %v333_v21 }
 0x30e   :  { %v2542_v29 = vpop.eup %2541 }
 0x30f   :  { %v2946_v31 = vmul.f32 %v2542_v29, %v387_v30 }
 0x311   :  { %v396_v33 = vsel %vm54_vm5, %v2946_v31, %v332_v32 }
 0x312   :  { %v398_v34 = vpack.c.bf16 %v396_v33, %v396_v33 }
 0x314   :  { %2106 = vmatmul.mubr.bf16.vlgmr.msra.gmra.mrb[4].mxu1 %v398_v34 }
 0x315   :  { %2130 = vmatpush3.bf16.msra.mxu1 %v2731_v1  ;;  %2145 = vmatprep.mubr.msk.bf16.mxu1 %vm2656_vm0, %v2655_v0 }
 0x316   :  { %2131 = vmatprep.subr.bf16.mxu1 %v2655_v0 }
 0x319   :  { %2132 = vmatpush3.bf16.msra.mxu1 %v2739_v2 }
 0x31a   :  { %2133 = vmatprep.subr.bf16.mxu1 %v2655_v0 }
 0x31d   :  { %2134 = vmatpush3.bf16.msra.mxu1 %v2752_v5 }
 0x31e   :  { %2135 = vmatprep.subr.bf16.mxu1 %v2655_v0 }
 0x321   :  { %2136 = vmatpush3.bf16.msra.mxu1 %v2761_v7 }
 0x322   :  { %2137 = vmatprep.subr.bf16.mxu1 %v2655_v0 }
 0x325   :  { %2138 = vmatpush3.bf16.msra.mxu1 %v2779_v12 }
 0x326   :  { %2139 = vmatprep.subr.bf16.mxu1 %v2655_v0 }
 0x329   :  { %2140 = vmatpush3.bf16.msra.mxu1 %v2792_v16 }
 0x32a   :  { %2141 = vmatprep.subr.bf16.mxu1 %v2655_v0 }
 0x32d   :  { %2142 = vmatpush3.bf16.msra.mxu1 %v2801_v17 }
 0x32e   :  { %2143 = vmatprep.subr.bf16.mxu1 %v2655_v0 }
 0x331   :  { %2144 = vmatpush3.bf16.msra.mxu1 %v2810_v18 }
 0x332   :  { %2169 = vmatprep.subr.bf16.mxu1 %v2655_v0 }
 0x3e7   :  { %v433_v37 = vpop.f32.mrb[4].mxu1 }
 0x3e8   :  { %v439_v38 = vadd.f32 %v433_v37, %v184_v36  ;;  %v2107_v39 = vpop.f32.mrb[5].mxu1 }
 0x3e9   :  { %v436_v40 = vpop.f32.mrb[6].mxu1 }
 0x3ea   :  { %v1772_v41 = vmul.f32 -1.442695, %v439_v38  ;;  %v2108_v42 = vpop.f32.mrb[7].mxu1 }
 0x3ec   :  { %2543 = vpow2.f32 %v1772_v41  ;;  %v192_v41 = vadd.f32 %v2857_v24, %v2923_v57  ;;  %v3057_v57 = vld [vmem:[%s3619_s1 + $0x20] sm:$0xff] }
 0x3ed   :  { %2545 = vtanh.f32 %v439_v38  ;;  %vm57_vm8 = vcmp.gt.f32.partialorder %v3057_v57, 0.0 }
 0x3f6   :  { %v2544_v43 = vpop.eup %2543 }
 0x3f7   :  { %v443_v44 = vadd.f32 1.0, %v2544_v43  ;;  %v2546_v45 = vpop.eup %2545 }
 0x3f9   :  { %2547 = vrcp.f32 %v443_v44 }
 0x403   :  { %v2548_v46 = vpop.eup %2547 }
 0x404   :  { %v447_v47 = vsel %vm44_vm2, %v2548_v46, %v2546_v45 }
 0x405   :  { %452 = vrot.lane.b32.xlu1 %v447_v47, %s2660_s0  ;;  %448 = vrot.lane.b32.xlu0 %v447_v47, %s2659_s25 }
 0x409   :  { %450 = vrot.lane.b32.xlu0 %v447_v47, %s2658_s24 }
 0x477   :  { %v453_v48 = vpop.permute.xlu1 %452  ;;  %v449_v49 = vpop.permute.xlu0 %448 }
 0x478   :  { %v455_v51 = vmul.f32 %v453_v48, %v447_v47  ;;  %v454_v52 = vmul.f32 %v449_v49, %v397_v28 }
 0x47a   :  { %v456_v55 = vadd.f32 %v455_v51, %v454_v52 }
 0x47b   :  { %v451_v62 = vpop.permute.xlu0 %450 }
 0x47c   :  { %2549 = vtanh.f32 %v456_v55  ;;  %v461_v60 = vsel %vm55_vm6, %v456_v55, %v397_v28 }
 0x486   :  { %v2550_v61 = vpop.eup %2549 }
 0x487   :  { %v2987_v63 = vmul.f32 %v2550_v61, %v451_v62 }
 0x489   :  { %v460_v3 = vsel %vm55_vm6, %v2987_v63, %v396_v33 }
 0x48a   :  { %v462_v4 = vpack.c.bf16 %v460_v3, %v460_v3 }
 0x48c   :  { %2126 = vmatmul.mubr.bf16.vlgmr.msra.gmra.mrb[12].mxu0 %v462_v4 }
 0x48d   :  { %2150 = vmatpush3.bf16.msra.mxu0 %v2731_v1  ;;  %2165 = vmatprep.mubr.msk.bf16.mxu0 %vm2656_vm0, %v2655_v0 }
 0x48e   :  { %2151 = vmatprep.subr.bf16.mxu0 %v2655_v0 }
 0x491   :  { %2152 = vmatpush3.bf16.msra.mxu0 %v2739_v2 }
 0x492   :  { %2153 = vmatprep.subr.bf16.mxu0 %v2655_v0 }
 0x495   :  { %2154 = vmatpush3.bf16.msra.mxu0 %v2752_v5 }
 0x496   :  { %2155 = vmatprep.subr.bf16.mxu0 %v2655_v0 }
 0x499   :  { %2156 = vmatpush3.bf16.msra.mxu0 %v2761_v7 }
 0x49a   :  { %2157 = vmatprep.subr.bf16.mxu0 %v2655_v0 }
 0x49d   :  { %2158 = vmatpush3.bf16.msra.mxu0 %v2779_v12 }
 0x49e   :  { %2159 = vmatprep.subr.bf16.mxu0 %v2655_v0 }
 0x4a1   :  { %2160 = vmatpush3.bf16.msra.mxu0 %v2792_v16 }
 0x4a2   :  { %2161 = vmatprep.subr.bf16.mxu0 %v2655_v0 }
 0x4a5   :  { %2162 = vmatpush3.bf16.msra.mxu0 %v2801_v17 }
 0x4a6   :  { %2163 = vmatprep.subr.bf16.mxu0 %v2655_v0 }
 0x4a9   :  { %2164 = vmatpush3.bf16.msra.mxu0 %v2810_v18 }
 0x4aa   :  { %2189 = vmatprep.subr.bf16.mxu0 %v2655_v0 }
 0x55f   :  { %v497_v8 = vpop.f32.mrb[12].mxu0 }
 0x560   :  { %v503_v9 = vadd.f32 %v497_v8, %v187_v6  ;;  %v2127_v10 = vpop.f32.mrb[13].mxu0 }
 0x561   :  { %v500_v11 = vpop.f32.mrb[14].mxu0 }
 0x562   :  { %v1773_v13 = vmul.f32 -1.442695, %v503_v9  ;;  %v2128_v15 = vpop.f32.mrb[15].mxu0 }
 0x564   :  { %2551 = vpow2.f32 %v1773_v13 }
 0x565   :  { %2553 = vtanh.f32 %v503_v9 }
 0x56e   :  { %v2552_v21 = vpop.eup %2551 }
 0x56f   :  { %v507_v23 = vadd.f32 1.0, %v2552_v21  ;;  %v2554_v25 = vpop.eup %2553 }
 0x571   :  { %2555 = vrcp.f32 %v507_v23 }
 0x57b   :  { %v2556_v26 = vpop.eup %2555 }
 0x57c   :  { %v511_v27 = vsel %vm44_vm2, %v2556_v26, %v2554_v25 }
 0x57d   :  { %516 = vrot.lane.b32.xlu0 %v511_v27, %s2660_s0  ;;  %512 = vrot.lane.b32.xlu1 %v511_v27, %s2659_s25 }
 0x581   :  { %514 = vrot.lane.b32.xlu1 %v511_v27, %s2658_s24 }
 0x5ef   :  { %v517_v28 = vpop.permute.xlu0 %516  ;;  %v513_v29 = vpop.permute.xlu1 %512 }
 0x5f0   :  { %v519_v30 = vmul.f32 %v517_v28, %v511_v27  ;;  %v518_v32 = vmul.f32 %v513_v29, %v461_v60 }
 0x5f2   :  { %v520_v33 = vadd.f32 %v519_v30, %v518_v32 }
 0x5f3   :  { %v515_v37 = vpop.permute.xlu1 %514 }
 0x5f4   :  { %2557 = vtanh.f32 %v520_v33  ;;  %v525_v34 = vsel %vm56_vm7, %v520_v33, %v461_v60 }
 0x5fe   :  { %v2558_v36 = vpop.eup %2557 }
 0x5ff   :  { %v3025_v38 = vmul.f32 %v2558_v36, %v515_v37 }
 0x601   :  { %v524_v39 = vsel %vm56_vm7, %v3025_v38, %v460_v3 }
 0x602   :  { %v526_v40 = vpack.c.bf16 %v524_v39, %v524_v39 }
 0x604   :  { %2146 = vmatmul.mubr.bf16.vlgmr.msra.gmra.mrb[8].mxu1 %v526_v40  ;;  %v200_v40 = vadd.f32 %v2921_v56, %v2857_v24  ;;  %v3115_v56 = vld [vmem:[%s3619_s1 + $0x30] sm:$0xff] }
 0x605   :  { %2170 = vmatpush3.bf16.msra.mxu1 %v2731_v1  ;;  %2185 = vmatprep.mubr.msk.bf16.mxu1 %vm2656_vm0, %v2655_v0  ;;  %vm59_vm10 = vcmp.gt.f32.partialorder %v3115_v56, 0.0  ;;  %v1653_v56 = vld [vmem:[%s3625_s10 + $0x10] sm:$0xff] }
 0x606   :  { %2171 = vmatprep.subr.bf16.mxu1 %v2655_v0 }
 0x609   :  { %2172 = vmatpush3.bf16.msra.mxu1 %v2739_v2 }
 0x60a   :  { %2173 = vmatprep.subr.bf16.mxu1 %v2655_v0 }
 0x60d   :  { %2174 = vmatpush3.bf16.msra.mxu1 %v2752_v5 }
 0x60e   :  { %2175 = vmatprep.subr.bf16.mxu1 %v2655_v0 }
 0x611   :  { %2176 = vmatpush3.bf16.msra.mxu1 %v2761_v7 }
 0x612   :  { %2177 = vmatprep.subr.bf16.mxu1 %v2655_v0 }
 0x615   :  { %2178 = vmatpush3.bf16.msra.mxu1 %v2779_v12 }
 0x616   :  { %2179 = vmatprep.subr.bf16.mxu1 %v2655_v0 }
 0x619   :  { %2180 = vmatpush3.bf16.msra.mxu1 %v2792_v16 }
 0x61a   :  { %2181 = vmatprep.subr.bf16.mxu1 %v2655_v0 }
 0x61d   :  { %2182 = vmatpush3.bf16.msra.mxu1 %v2801_v17 }
 0x61e   :  { %2183 = vmatprep.subr.bf16.mxu1 %v2655_v0 }
 0x621   :  { %2184 = vmatpush3.bf16.msra.mxu1 %v2810_v18 }
 0x6d7   :  { %v561_v42 = vpop.f32.mrb[8].mxu1 }
 0x6d8   :  { %v567_v43 = vadd.f32 %v561_v42, %v192_v41  ;;  %v2147_v44 = vpop.f32.mrb[9].mxu1 }
 0x6d9   :  { %v564_v45 = vpop.f32.mrb[10].mxu1 }
 0x6da   :  { %v1774_v46 = vmul.f32 -1.442695, %v567_v43  ;;  %v2148_v47 = vpop.f32.mrb[11].mxu1 }
 0x6dc   :  { %2559 = vpow2.f32 %v1774_v46 }
 0x6dd   :  { %2561 = vtanh.f32 %v567_v43 }
 0x6e6   :  { %v2560_v48 = vpop.eup %2559 }
 0x6e7   :  { %v571_v49 = vadd.f32 1.0, %v2560_v48  ;;  %v2562_v51 = vpop.eup %2561 }
 0x6e9   :  { %2563 = vrcp.f32 %v571_v49 }
 0x6f3   :  { %v2564_v52 = vpop.eup %2563 }
 0x6f4   :  { %v575_v55 = vsel %vm44_vm2, %v2564_v52, %v2562_v51 }
 0x6f5   :  { %580 = vrot.lane.b32.xlu1 %v575_v55, %s2660_s0  ;;  %576 = vrot.lane.b32.xlu0 %v575_v55, %s2659_s25 }
 0x6f9   :  { %578 = vrot.lane.b32.xlu0 %v575_v55, %s2658_s24 }
 0x767   :  { %v581_v60 = vpop.permute.xlu1 %580  ;;  %v577_v61 = vpop.permute.xlu0 %576 }
 0x768   :  { %v583_v62 = vmul.f32 %v581_v60, %v575_v55  ;;  %v582_v3 = vmul.f32 %v577_v61, %v525_v34 }
 0x76a   :  { %v584_v4 = vadd.f32 %v583_v62, %v582_v3 }
 0x76b   :  { %v579_v9 = vpop.permute.xlu0 %578 }
 0x76c   :  { %2565 = vtanh.f32 %v584_v4  ;;  %v589_v6 = vsel %vm57_vm8, %v584_v4, %v525_v34 }
 0x776   :  { %v2566_v8 = vpop.eup %2565 }
 0x777   :  { %v3062_v10 = vmul.f32 %v2566_v8, %v579_v9 }
 0x779   :  { %v588_v11 = vsel %vm57_vm8, %v3062_v10, %v524_v39 }
 0x77a   :  { %v590_v13 = vpack.c.bf16 %v588_v11, %v588_v11 }
 0x77c   :  { %2166 = vmatmul.mubr.bf16.vlgmr.msra.gmra.mrb[16].mxu0 %v590_v13 }
 0x77d   :  { %2190 = vmatpush3.bf16.msra.mxu0 %v2731_v1  ;;  %2205 = vmatprep.mubr.msk.bf16.mxu0 %vm2656_vm0, %v2655_v0  ;;  %v195_v1 = vadd.f32 %v2857_v24, %v2927_v59  ;;  %v3095_v59 = vld [vmem:[%s3619_s1 + $0x28] sm:$0xff] }
 0x77e   :  { %2191 = vmatprep.subr.bf16.mxu0 %v2655_v0  ;;  %vm58_vm9 = vcmp.gt.f32.partialorder %v3095_v59, 0.0 }
 0x77f   :  { %vm1789_vm13 = vmpackc.low %vm57_vm8, %vm58_vm9 }
 0x781   :  { %2192 = vmatpush3.bf16.msra.mxu0 %v2739_v2 }
 0x782   :  { %2193 = vmatprep.subr.bf16.mxu0 %v2655_v0 }
 0x785   :  { %2194 = vmatpush3.bf16.msra.mxu0 %v2752_v5 }
 0x786   :  { %2195 = vmatprep.subr.bf16.mxu0 %v2655_v0 }
 0x789   :  { %2196 = vmatpush3.bf16.msra.mxu0 %v2761_v7 }
 0x78a   :  { %2197 = vmatprep.subr.bf16.mxu0 %v2655_v0 }
 0x78d   :  { %2198 = vmatpush3.bf16.msra.mxu0 %v2779_v12 }
 0x78e   :  { %2199 = vmatprep.subr.bf16.mxu0 %v2655_v0 }
 0x791   :  { %2200 = vmatpush3.bf16.msra.mxu0 %v2792_v16 }
 0x792   :  { %2201 = vmatprep.subr.bf16.mxu0 %v2655_v0 }
 0x795   :  { %2202 = vmatpush3.bf16.msra.mxu0 %v2801_v17 }
 0x796   :  { %2203 = vmatprep.subr.bf16.mxu0 %v2655_v0 }
 0x799   :  { %2204 = vmatpush3.bf16.msra.mxu0 %v2810_v18 }
 0x79a   :  { %2257 = vmatprep.subr.bf16.mxu0 %v2655_v0 }
 0x84f   :  { %v625_v2 = vpop.f32.mrb[16].mxu0 }
 0x850   :  { %v631_v5 = vadd.f32 %v625_v2, %v195_v1  ;;  %v2167_v7 = vpop.f32.mrb[17].mxu0  ;;  %v2503_v1 = vld [vmem:[%s3620_s7] sm:$0xff]   ;;  %v2504_v2 = vld [vmem:[%s3620_s7 + $0x8] sm:$0xff]  }
 0x851   :  { %v628_v12 = vpop.f32.mrb[18].mxu0  ;;  %2209 = vmatprep.subr.bf16.mxu1 %v2503_v1  ;;  %v2506_v7 = vld [vmem:[%s3620_s7 + $0x18] sm:$0xff]  }
 0x852   :  { %v1775_v15 = vmul.f32 -1.442695, %v631_v5  ;;  %v2168_v21 = vpop.f32.mrb[19].mxu0  ;;  %v203_v12 = vadd.f32 %v2925_v58, %v2857_v24  ;;  %v2508_v24 = vld [vmem:[%s3620_s7 + $0x28] sm:$0xff]   ;;  %v2509_v58 = vld [vmem:[%s3620_s7 + $0x30] sm:$0xff]  }
 0x854   :  { %2567 = vpow2.f32 %v1775_v15 }
 0x855   :  { %2569 = vtanh.f32 %v631_v5  ;;  %v2505_v5 = vld [vmem:[%s3620_s7 + $0x10] sm:$0xff]  }
 0x85e   :  { %v2568_v16 = vpop.eup %2567 }
 0x85f   :  { %v635_v23 = vadd.f32 1.0, %v2568_v16  ;;  %v2570_v17 = vpop.eup %2569 }
 0x861   :  { %2571 = vrcp.f32 %v635_v23 }
 0x86b   :  { %v2572_v25 = vpop.eup %2571 }
 0x86c   :  { %v639_v18 = vsel %vm44_vm2, %v2572_v25, %v2570_v17 }
 0x86d   :  { %644 = vrot.lane.b32.xlu0 %v639_v18, %s2660_s0  ;;  %640 = vrot.lane.b32.xlu1 %v639_v18, %s2659_s25 }
 0x871   :  { %642 = vrot.lane.b32.xlu1 %v639_v18, %s2658_s24 }
 0x8df   :  { %v645_v26 = vpop.permute.xlu0 %644  ;;  %v641_v27 = vpop.permute.xlu1 %640 }
 0x8e0   :  { %v647_v28 = vmul.f32 %v645_v26, %v639_v18  ;;  %v646_v29 = vmul.f32 %v641_v27, %v589_v6  ;;  %v2507_v27 = vld [vmem:[%s3620_s7 + $0x20] sm:$0xff]  }
 0x8e2   :  { %v648_v30 = vadd.f32 %v647_v28, %v646_v29 }
 0x8e3   :  { %v643_v34 = vpop.permute.xlu1 %642 }
 0x8e4   :  { %2573 = vtanh.f32 %v648_v30  ;;  %v653_v32 = vsel %vm58_vm9, %v648_v30, %v589_v6 }
 0x8ee   :  { %v2574_v33 = vpop.eup %2573 }
 0x8ef   :  { %v3100_v36 = vmul.f32 %v2574_v33, %v643_v34  ;;  %v3163_v33 = vld [vmem:[%s3621_s6] sm:$0xff]  }
 0x8f0   :  { %v3169_v34 = vld [vmem:[%s3622_s8] sm:$0xff]  }
 0x8f1   :  { %v652_v37 = vsel %vm58_vm9, %v3100_v36, %v588_v11 }
 0x8f2   :  { %v654_v39 = vpack.c.bf16 %v652_v37, %v652_v37 }
 0x8f4   :  { %2186 = vmatmul.mubr.bf16.vlgmr.msra.gmra.mrb[12].mxu1 %v654_v39  ;;  %v3183_v39 = vld [vmem:[%s3622_s8 + $0x10] sm:$0xff]  }
 0x8f5   :  { %2210 = vmatpush3.bf16.msra.mxu1 %v2503_v1  ;;  %v2521_v1 = vld [vmem:[%s3621_s6 + $0x28] sm:$0xff]  }
 0x8f6   :  { %2211 = vmatprep.subr.bf16.mxu1 %v2504_v2 }
 0x8f9   :  { %2212 = vmatpush3.bf16.msra.mxu1 %v2504_v2  ;;  %v1810_v2 = vpack.c.bf16 %v3025_v38, %v2987_v63 }
 0x8fa   :  { %2213 = vmatprep.subr.bf16.mxu1 %v2505_v5 }
 0x8fd   :  { %2214 = vmatpush3.bf16.msra.mxu1 %v2505_v5  ;;  %v1813_v5 = vpack.c.bf16 %v3100_v36, %v3062_v10 }
 0x8fe   :  { %2215 = vmatprep.subr.bf16.mxu1 %v2506_v7 }
 0x901   :  { %2216 = vmatpush3.bf16.msra.mxu1 %v2506_v7  ;;  %v1818_v7 = vld [vmem:[%s3623_s9] ss:$0 sm:$0xff] }
 0x902   :  { %2217 = vmatprep.subr.bf16.mxu1 %v2507_v27 }
 0x905   :  { %2218 = vmatpush3.bf16.msra.mxu1 %v2507_v27 }
 0x906   :  { %2219 = vmatprep.subr.bf16.mxu1 %v2508_v24 }
 0x909   :  { %2220 = vmatpush3.bf16.msra.mxu1 %v2508_v24 }
 0x90a   :  { %2221 = vmatprep.subr.bf16.mxu1 %v2509_v58 }
 0x90d   :  { %2222 = vmatpush3.bf16.msra.mxu1 %v2509_v58 }
 0x9c7   :  { %v689_v41 = vpop.f32.mrb[12].mxu1 }
 0x9c8   :  { %v695_v42 = vadd.f32 %v689_v41, %v200_v40  ;;  %v2187_v43 = vpop.f32.mrb[13].mxu1  ;;  %v3190_v40 = vld [vmem:[%s3622_s8 + $0x18] sm:$0xff]   ;;  %v3197_v41 = vld [vmem:[%s3622_s8 + $0x20] sm:$0xff]  }
 0x9c9   :  { %v692_v44 = vpop.f32.mrb[14].mxu1  ;;  %v3211_v43 = vld [vmem:[%s3622_s8 + $0x30] sm:$0xff]  }
 0x9ca   :  { %v1776_v45 = vmul.f32 -1.442695, %v695_v42  ;;  %v2188_v46 = vpop.f32.mrb[15].mxu1  ;;  %v3218_v44 = vld [vmem:[%s3622_s8 + $0x38] sm:$0xff]  }
 0x9cc   :  { %2575 = vpow2.f32 %v1776_v45 }
 0x9cd   :  { %2577 = vtanh.f32 %v695_v42  ;;  %v3204_v42 = vld [vmem:[%s3622_s8 + $0x28] sm:$0xff]  }
 0x9d6   :  { %v2576_v47 = vpop.eup %2575 }
 0x9d7   :  { %v699_v48 = vadd.f32 1.0, %v2576_v47  ;;  %v2578_v49 = vpop.eup %2577 }
 0x9d9   :  { %2579 = vrcp.f32 %v699_v48 }
 0x9e3   :  { %v2580_v51 = vpop.eup %2579 }
 0x9e4   :  { %v703_v52 = vsel %vm44_vm2, %v2580_v51, %v2578_v49  ;;  %v3245_v49 = vld [vmem:[%s3619_s1 + $0x38] sm:$0xff] }
 0x9e5   :  { %708 = vrot.lane.b32.xlu1 %v703_v52, %s2660_s0  ;;  %704 = vrot.lane.b32.xlu0 %v703_v52, %s2659_s25  ;;  %vm60_vm11 = vcmp.gt.f32.partialorder %v3245_v49, 0.0 }
 0x9e6   :  { %vm1786_vm12 = vmpackc.low %vm59_vm10, %vm60_vm11 }
 0x9e9   :  { %706 = vrot.lane.b32.xlu0 %v703_v52, %s2658_s24 }
 0xa57   :  { %v709_v55 = vpop.permute.xlu1 %708  ;;  %v705_v60 = vpop.permute.xlu0 %704 }
 0xa58   :  { %v711_v61 = vmul.f32 %v709_v55, %v703_v52  ;;  %v710_v62 = vmul.f32 %v705_v60, %v653_v32 }
 0xa5a   :  { %v712_v3 = vadd.f32 %v711_v61, %v710_v62  ;;  %v1790_v61 = vpack.c.bf16 %v3062_v10, %v3100_v36  ;;  %v2513_v62 = vld [vmem:[%s3621_s6 + $0x8] sm:$0xff]  }
 0xa5b   :  { %v707_v8 = vpop.permute.xlu0 %706 }
 0xa5c   :  { %2581 = vtanh.f32 %v712_v3  ;;  %v3120_v4 = vsel %vm59_vm10, %v712_v3, %v653_v32  ;;  %v2510_v32 = vld [vmem:[%s3620_s7 + $0x38] sm:$0xff]   ;;  %v1793_v3 = vpack.c.bf16 %v2987_v63, %v3025_v38 }
 0xa5d   :  { %2223 = vmatprep.subr.bf16.mxu1 %v2510_v32 }
 0xa5e   :  { %2224 = vmatpush3.bf16.msra.mxu1 %v2510_v32 }
 0xa5f   :  { %2233 = vmatprep.subr.bf16.mxu1 %v3163_v33 }
 0xa66   :  { %v2582_v6 = vpop.eup %2581 }
 0xa67   :  { %v3122_v9 = vmul.f32 %v2582_v6, %v707_v8  ;;  %v1796_v6 = vpack.c.bf16 %v2889_v53, %v2946_v31  ;;  %v2517_v8 = vld [vmem:[%s3621_s6 + $0x18] sm:$0xff]  }
 0xa69   :  { %v716_v11 = vsel %vm59_vm10, %v3122_v9, %v652_v37  ;;  %v3176_v37 = vld [vmem:[%s3622_s8 + $0x8] sm:$0xff]  }
 0xa6a   :  { %v718_v13 = vpack.c.bf16 %v716_v11, %v716_v11  ;;  %v1807_v11 = vpack.c.bf16 %v2946_v31, %v2889_v53  ;;  %v2523_v53 = vld [vmem:[%s3621_s6 + $0x30] sm:$0xff]   ;;  %v2525_v31 = vld [vmem:[%s3621_s6 + $0x38] sm:$0xff]  }
 0xa6c   :  { %2206 = vmatmul.mubr.bf16.vlgmr.msra.gmra.mrb[20].mxu0 %v718_v13  ;;  %v2519_v13 = vld [vmem:[%s3621_s6 + $0x20] sm:$0xff]  }
 0xa6d   :  { %2273 = vmatprep.mubr.msk.bf16.mxu0 %vm2656_vm0, %v2655_v0  ;;  %2258 = vmatpush3.bf16.msra.mxu0 %v3169_v34 }
 0xa6e   :  { %2259 = vmatprep.subr.bf16.mxu0 %v2655_v0 }
 0xa71   :  { %2260 = vmatpush3.bf16.msra.mxu0 %v3176_v37 }
 0xa72   :  { %2261 = vmatprep.subr.bf16.mxu0 %v2655_v0 }
 0xa75   :  { %2262 = vmatpush3.bf16.msra.mxu0 %v3183_v39 }
 0xa76   :  { %2263 = vmatprep.subr.bf16.mxu0 %v2655_v0 }
 0xa79   :  { %2264 = vmatpush3.bf16.msra.mxu0 %v3190_v40 }
 0xa7a   :  { %2265 = vmatprep.subr.bf16.mxu0 %v2655_v0 }
 0xa7d   :  { %2266 = vmatpush3.bf16.msra.mxu0 %v3197_v41 }
 0xa7e   :  { %2267 = vmatprep.subr.bf16.mxu0 %v2655_v0 }
 0xa81   :  { %2268 = vmatpush3.bf16.msra.mxu0 %v3204_v42 }
 0xa82   :  { %2269 = vmatprep.subr.bf16.mxu0 %v2655_v0 }
 0xa85   :  { %2270 = vmatpush3.bf16.msra.mxu0 %v3211_v43 }
 0xa86   :  { %2271 = vmatprep.subr.bf16.mxu0 %v2655_v0 }
 0xa89   :  { %2272 = vmatpush3.bf16.msra.mxu0 %v3218_v44 }
 0xa8a   :  { %2277 = vmatprep.subr.bf16.mxu0 %v2655_v0 }
 0xa8c   :  { %2274 = vmatmul.mubr.bf16.vlgmr.msra.gmra.mrb[24].mxu0 %v2657_v19 }
 0xa8d   :  { %2278 = vmatpush3.bf16.msra.mxu0 %v3169_v34  ;;  %2293 = vmatprep.mubr.msk.bf16.mxu0 %vm2656_vm0, %v2655_v0 }
 0xa8e   :  { %2279 = vmatprep.subr.bf16.mxu0 %v2655_v0 }
 0xa91   :  { %2280 = vmatpush3.bf16.msra.mxu0 %v3176_v37 }
 0xa92   :  { %2281 = vmatprep.subr.bf16.mxu0 %v2655_v0 }
 0xa95   :  { %2282 = vmatpush3.bf16.msra.mxu0 %v3183_v39 }
 0xa96   :  { %2283 = vmatprep.subr.bf16.mxu0 %v2655_v0 }
 0xa99   :  { %2284 = vmatpush3.bf16.msra.mxu0 %v3190_v40 }
 0xa9a   :  { %2285 = vmatprep.subr.bf16.mxu0 %v2655_v0 }
 0xa9d   :  { %2286 = vmatpush3.bf16.msra.mxu0 %v3197_v41 }
 0xa9e   :  { %2287 = vmatprep.subr.bf16.mxu0 %v2655_v0 }
 0xaa1   :  { %2288 = vmatpush3.bf16.msra.mxu0 %v3204_v42 }
 0xaa2   :  { %2289 = vmatprep.subr.bf16.mxu0 %v2655_v0 }
 0xaa5   :  { %2290 = vmatpush3.bf16.msra.mxu0 %v3211_v43 }
 0xaa6   :  { %2291 = vmatprep.subr.bf16.mxu0 %v2655_v0 }
 0xaa9   :  { %2292 = vmatpush3.bf16.msra.mxu0 %v3218_v44 }
 0xaaa   :  { %2317 = vmatprep.subr.bf16.mxu0 %v2655_v0 }
 0xb3f   :  { %v753_v15 = vpop.f32.mrb[20].mxu0 }
 0xb40   :  { %v759_v21 = vadd.f32 %v753_v15, %v203_v12  ;;  %v2207_v16 = vpop.f32.mrb[21].mxu0 }
 0xb41   :  { %v756_v23 = vpop.f32.mrb[22].mxu0 }
 0xb42   :  { %v1777_v17 = vmul.f32 -1.442695, %v759_v21  ;;  %v2208_v25 = vpop.f32.mrb[23].mxu0 }
 0xb44   :  { %2583 = vpow2.f32 %v1777_v17 }
 0xb45   :  { %2585 = vtanh.f32 %v759_v21 }
 0xb4e   :  { %v2584_v18 = vpop.eup %2583 }
 0xb4f   :  { %v763_v26 = vadd.f32 1.0, %v2584_v18  ;;  %v2586_v28 = vpop.eup %2585 }
 0xb51   :  { %2587 = vrcp.f32 %v763_v26 }
 0xb5b   :  { %v2588_v29 = vpop.eup %2587 }
 0xb5c   :  { %v767_v30 = vsel %vm44_vm2, %v2588_v29, %v2586_v28 }
 0xb5d   :  { %772 = vrot.lane.b32.xlu0 %v767_v30, %s2660_s0  ;;  %768 = vrot.lane.b32.xlu1 %v767_v30, %s2659_s25 }
 0xb5f   :  { %v1159_v38 = vpop.f32.mrb[24].mxu0 }
 0xb60   :  { %v2275_v10 = vpop.f32.mrb[25].mxu0 }
 0xb61   :  { %770 = vrot.lane.b32.xlu1 %v767_v30, %s2658_s24  ;;  %v1162_v36 = vpop.f32.mrb[26].mxu0 }
 0xbcf   :  { %v773_v19 = vpop.permute.xlu0 %772  ;;  %v769_v45 = vpop.permute.xlu1 %768 }
 0xbd0   :  { %v775_v46 = vmul.f32 %v773_v19, %v767_v30  ;;  %v774_v47 = vmul.f32 %v769_v45, %v3120_v4  ;;  %v2515_v4 = vld [vmem:[%s3621_s6 + $0x10] sm:$0xff]  }
 0xbd2   :  { %v776_v48 = vadd.f32 %v775_v46, %v774_v47 }
 0xbd3   :  { %v771_v52 = vpop.permute.xlu1 %770 }
 0xbd4   :  { %2589 = vtanh.f32 %v776_v48 }
 0xbde   :  { %v2590_v51 = vpop.eup %2589 }
 0xbdf   :  { %v778_v55 = vmul.f32 %v2590_v51, %v771_v52 }
 0xbe1   :  { %v1787_v60 = vpack.c.bf16 %v3122_v9, %v778_v55  ;;  %v1816_v63 = vpack.c.bf16 %v778_v55, %v3122_v9  ;;  %v2276_v9 = vpop.f32.mrb[27].mxu0 }
 0xbe3   :  { %2225 = vmatprep.mubr.msk.bf16.mxu1 %vm1786_vm12, %v1787_v60  ;;  %vm1809_vm12 = vmpackc.low %vm56_vm7, %vm55_vm6 }
 0xbe4   :  { %2226 = vmatmul.mubr.msk.bf16.vlgmr.msra.gmra.mrb[16].mxu1 %vm1789_vm13, %v1790_v61  ;;  %vm1812_vm13 = vmpackc.low %vm58_vm9, %vm57_vm8 }
 0xbe5   :  { %2234 = vmatpush3.bf16.msra.mxu1 %v3163_v33  ;;  %2229 = vmatprep.mubr.msk.bf16.mxu1 %vm1792_vm14, %v1793_v3  ;;  %vm1815_vm14 = vmpackc.low %vm60_vm11, %vm59_vm10 }
 0xbe6   :  { %2235 = vmatprep.subr.bf16.mxu1 %v2513_v62 }
 0xbe9   :  { %2236 = vmatpush3.bf16.msra.mxu1 %v2513_v62 }
 0xbea   :  { %2237 = vmatprep.subr.bf16.mxu1 %v2515_v4 }
 0xbec   :  { %2230 = vmatmul.mubr.msk.bf16.gmra.mrb[20].mxu1 %vm1795_vm15, %v1796_v6 }
 0xbed   :  { %2238 = vmatpush3.bf16.msra.mxu1 %v2515_v4  ;;  %2249 = vmatprep.mubr.msk.bf16.mxu1 %vm1806_vm1, %v1807_v11 }
 0xbee   :  { %2239 = vmatprep.subr.bf16.mxu1 %v2517_v8 }
 0xbf1   :  { %2240 = vmatpush3.bf16.msra.mxu1 %v2517_v8 }
 0xbf2   :  { %2241 = vmatprep.subr.bf16.mxu1 %v2519_v13 }
 0xbf5   :  { %2242 = vmatpush3.bf16.msra.mxu1 %v2519_v13 }
 0xbf6   :  { %2243 = vmatprep.subr.bf16.mxu1 %v2521_v1 }
 0xbf9   :  { %2244 = vmatpush3.bf16.msra.mxu1 %v2521_v1 }
 0xbfa   :  { %2245 = vmatprep.subr.bf16.mxu1 %v2523_v53 }
 0xbfd   :  { %2246 = vmatpush3.bf16.msra.mxu1 %v2523_v53 }
 0xbfe   :  { %2247 = vmatprep.subr.bf16.mxu1 %v2525_v31 }
 0xc01   :  { %2248 = vmatpush3.bf16.msra.mxu1 %v2525_v31 }
 0xc02   :  { %2297 = vmatprep.subr.bf16.mxu1 %v2655_v0 }
 0xc04   :  { %2250 = vmatmul.mubr.msk.bf16.vlgmr.msra.gmra.mrb[16].mxu1 %vm1809_vm12, %v1810_v2 }
 0xc05   :  { %2253 = vmatprep.mubr.msk.bf16.mxu1 %vm1812_vm13, %v1813_v5  ;;  %2298 = vmatpush3.bf16.msra.mxu1 %v3169_v34 }
 0xc06   :  { %2299 = vmatprep.subr.bf16.mxu1 %v2655_v0 }
 0xc09   :  { %2300 = vmatpush3.bf16.msra.mxu1 %v3176_v37 }
 0xc0a   :  { %2301 = vmatprep.subr.bf16.mxu1 %v2655_v0 }
 0xc0c   :  { %2254 = vmatmul.mubr.msk.bf16.gmra.mrb[20].mxu1 %vm1815_vm14, %v1816_v63 }
 0xc0d   :  { %2302 = vmatpush3.bf16.msra.mxu1 %v3183_v39  ;;  %2313 = vmatprep.mubr.msk.bf16.mxu1 %vm2656_vm0, %v2655_v0 }
 0xc0e   :  { %2303 = vmatprep.subr.bf16.mxu1 %v2655_v0 }
 0xc11   :  { %2304 = vmatpush3.bf16.msra.mxu1 %v3190_v40 }
 0xc12   :  { %2305 = vmatprep.subr.bf16.mxu1 %v2655_v0 }
 0xc15   :  { %2306 = vmatpush3.bf16.msra.mxu1 %v3197_v41 }
 0xc16   :  { %2307 = vmatprep.subr.bf16.mxu1 %v2655_v0 }
 0xc19   :  { %2308 = vmatpush3.bf16.msra.mxu1 %v3204_v42 }
 0xc1a   :  { %2309 = vmatprep.subr.bf16.mxu1 %v2655_v0 }
 0xc1d   :  { %2310 = vmatpush3.bf16.msra.mxu1 %v3211_v43 }
 0xc1e   :  { %2311 = vmatprep.subr.bf16.mxu1 %v2655_v0 }
 0xc21   :  { %2312 = vmatpush3.bf16.msra.mxu1 %v3218_v44 }
 0xc22   :  { %2337 = vmatprep.subr.bf16.mxu1 %v2655_v0 }
 0xcd7   :  { %v2251_v12 = vpop.f32.mrb[16].mxu1 }
 0xcd8   :  { %v3338_v15 = vadd.f32 %v2251_v12, %v1818_v7  ;;  %v1015_v21 = vpop.f32.mrb[17].mxu1 }
 0xcd9   :  { %v1053_v16 = vadd.f32 %v1818_v7, %v1015_v21  ;;  %v2252_v23 = vpop.f32.mrb[18].mxu1 }
 0xcda   :  { %v3340_v17 = vadd.f32 %v2252_v23, %v1818_v7  ;;  %v1018_v25 = vpop.f32.mrb[19].mxu1 }
 0xcdb   :  { %v1165_v18 = vadd.f32 %v1159_v38, %v1053_v16  ;;  %v1054_v26 = vadd.f32 %v1818_v7, %v1018_v25 }
 0xcdd   :  { %v1827_v27 = vmul.f32 -1.442695, %v1165_v18 }
 0xcdf   :  { %2591 = vpow2.f32 %v1827_v27  ;;  %v2255_v24 = vpop.f32.mrb[20].mxu1 }
 0xce0   :  { %v3342_v58 = vadd.f32 %v2255_v24, %v1818_v7  ;;  %v1031_v28 = vpop.f32.mrb[21].mxu1  ;;  %2593 = vtanh.f32 %v1165_v18 }
 0xce1   :  { %v3344_v29 = vadd.f32 %v1818_v7, %v1031_v28  ;;  %v2256_v30 = vpop.f32.mrb[22].mxu1 }
 0xce2   :  { %v3346_v32 = vadd.f32 %v2256_v30, %v1818_v7  ;;  %v1034_v33 = vpop.f32.mrb[23].mxu1 }
 0xce3   :  { %v3348_v19 = vadd.f32 %v1818_v7, %v1034_v33 }
 0xce9   :  { %v2592_v45 = vpop.eup %2591 }
 0xcea   :  { %v1169_v46 = vadd.f32 1.0, %v2592_v45  ;;  %v2594_v47 = vpop.eup %2593 }
 0xcec   :  { %2595 = vrcp.f32 %v1169_v46 }
 0xcf6   :  { %v2596_v48 = vpop.eup %2595 }
 0xcf7   :  { %v1173_v51 = vsel %vm44_vm2, %v2596_v48, %v2594_v47 }
 0xcf8   :  { %1178 = vrot.lane.b32.xlu1 %v1173_v51, %s2660_s0  ;;  %1174 = vrot.lane.b32.xlu0 %v1173_v51, %s2659_s25 }
 0xcfc   :  { %1176 = vrot.lane.b32.xlu0 %v1173_v51, %s2658_s24 }
 0xd6a   :  { %v1179_v52 = vpop.permute.xlu1 %1178  ;;  %v1175_v55 = vpop.permute.xlu0 %1174 }
 0xd6b   :  { %v1181_v60 = vmul.f32 %v1179_v52, %v1173_v51  ;;  %v1180_v61 = vmul.f32 0.0, %v1175_v55 }
 0xd6d   :  { %v1182_v62 = vadd.f32 %v1181_v60, %v1180_v61 }
 0xd6e   :  { %v1177_v4 = vpop.permute.xlu0 %1176 }
 0xd6f   :  { %2597 = vtanh.f32 %v1182_v62  ;;  %v1188_v9 = vsel %vm53_vm3, %v1182_v62, 0.0 }
 0xd79   :  { %v2598_v3 = vpop.eup %2597 }
 0xd7a   :  { %v1184_v6 = vmul.f32 %v2598_v3, %v1177_v4 }
 0xd7c   :  { %v1829_v8 = vpack.c.bf16 %v1184_v6, %v1184_v6  ;;  %v1185_v27 = vsel %vm53_vm3, %v1184_v6, 0.0 }
 0xd7e   :  { %2294 = vmatmul.mubr.msk.bf16.vlgmr.msra.gmra.mrb[28].mxu0 %vm2895_vm4, %v1829_v8  ;;  %v61_v8 = vld [vmem:[%s3624_s2] sm:$0xff] }
 0xd7f   :  { %2318 = vmatpush3.bf16.msra.mxu0 %v3169_v34  ;;  %2333 = vmatprep.mubr.msk.bf16.mxu0 %vm2656_vm0, %v2655_v0  ;;  %vm69_vm3 = vcmp.gt.f32.partialorder %v61_v8, 0.0 }
 0xd80   :  { %2319 = vmatprep.subr.bf16.mxu0 %v2655_v0 }
 0xd83   :  { %2320 = vmatpush3.bf16.msra.mxu0 %v3176_v37 }
 0xd84   :  { %2321 = vmatprep.subr.bf16.mxu0 %v2655_v0 }
 0xd87   :  { %2322 = vmatpush3.bf16.msra.mxu0 %v3183_v39 }
 0xd88   :  { %2323 = vmatprep.subr.bf16.mxu0 %v2655_v0 }
 0xd8b   :  { %2324 = vmatpush3.bf16.msra.mxu0 %v3190_v40 }
 0xd8c   :  { %2325 = vmatprep.subr.bf16.mxu0 %v2655_v0 }
 0xd8f   :  { %2326 = vmatpush3.bf16.msra.mxu0 %v3197_v41 }
 0xd90   :  { %2327 = vmatprep.subr.bf16.mxu0 %v2655_v0 }
 0xd93   :  { %2328 = vmatpush3.bf16.msra.mxu0 %v3204_v42 }
 0xd94   :  { %2329 = vmatprep.subr.bf16.mxu0 %v2655_v0 }
 0xd97   :  { %2330 = vmatpush3.bf16.msra.mxu0 %v3211_v43 }
 0xd98   :  { %2331 = vmatprep.subr.bf16.mxu0 %v2655_v0 }
 0xd9b   :  { %2332 = vmatpush3.bf16.msra.mxu0 %v3218_v44 }
 0xd9c   :  { %2357 = vmatprep.subr.bf16.mxu0 %v2655_v0 }
 0xe51   :  { %v1224_v54 = vpop.f32.mrb[28].mxu0 }
 0xe52   :  { %v1230_v11 = vadd.f32 %v1224_v54, %v1054_v26  ;;  %v2295_v13 = vpop.f32.mrb[29].mxu0  ;;  %v1186_v54 = vmax.f32 %v1185_v27, -1e+30 }
 0xe53   :  { %v1227_v1 = vpop.f32.mrb[30].mxu0  ;;  %v62_v13 = vld [vmem:[%s3624_s2 + $0x8] sm:$0xff] }
 0xe54   :  { %v1831_v53 = vmul.f32 -1.442695, %v1230_v11  ;;  %v2296_v31 = vpop.f32.mrb[31].mxu0  ;;  %v1187_v1 = vsel %vm69_vm3, %v1186_v54, -1e+30  ;;  %vm70_vm4 = vcmp.gt.f32.partialorder %v62_v13, 0.0 }
 0xe56   :  { %2599 = vpow2.f32 %v1831_v53 }
 0xe57   :  { %2601 = vtanh.f32 %v1230_v11 }
 0xe60   :  { %v2600_v2 = vpop.eup %2599 }
 0xe61   :  { %v1234_v5 = vadd.f32 1.0, %v2600_v2  ;;  %v2602_v63 = vpop.eup %2601 }
 0xe63   :  { %2603 = vrcp.f32 %v1234_v5  ;;  %v63_v5 = vld [vmem:[%s3624_s2 + $0x10] sm:$0xff] }
 0xe6d   :  { %v2604_v38 = vpop.eup %2603 }
 0xe6e   :  { %v1238_v10 = vsel %vm44_vm2, %v2604_v38, %v2602_v63 }
 0xe6f   :  { %1243 = vrot.lane.b32.xlu0 %v1238_v10, %s2660_s0  ;;  %1239 = vrot.lane.b32.xlu1 %v1238_v10, %s2659_s25 }
 0xe73   :  { %1241 = vrot.lane.b32.xlu1 %v1238_v10, %s2658_s24 }
 0xee1   :  { %v1244_v36 = vpop.permute.xlu0 %1243  ;;  %v1240_v7 = vpop.permute.xlu1 %1239 }
 0xee2   :  { %v1246_v12 = vmul.f32 %v1244_v36, %v1238_v10  ;;  %v1245_v21 = vmul.f32 %v1240_v7, %v1188_v9 }
 0xee4   :  { %v1247_v16 = vadd.f32 %v1246_v12, %v1245_v21 }
 0xee5   :  { %v1242_v18 = vpop.permute.xlu1 %1241 }
 0xee6   :  { %2605 = vtanh.f32 %v1247_v16  ;;  %v1254_v23 = vsel %vm54_vm5, %v1247_v16, %v1188_v9 }
 0xef0   :  { %v2606_v25 = vpop.eup %2605 }
 0xef1   :  { %v1249_v26 = vmul.f32 %v2606_v25, %v1242_v18 }
 0xef3   :  { %v1253_v24 = vsel %vm54_vm5, %v1249_v26, %v1185_v27  ;;  %v1250_v11 = vsel %vm54_vm5, %v1249_v26, 0.0  ;;  %vm71_vm5 = vcmp.gt.f32.partialorder %v63_v5, 0.0 }
 0xef4   :  { %v1255_v28 = vpack.c.bf16 %v1253_v24, %v1253_v24  ;;  %v1251_v53 = vmax.f32 %v1187_v1, %v1250_v11 }
 0xef6   :  { %2314 = vmatmul.mubr.bf16.vlgmr.msra.gmra.mrb[24].mxu1 %v1255_v28  ;;  %v1252_v38 = vsel %vm70_vm4, %v1251_v53, %v1187_v1 }
 0xef7   :  { %2338 = vmatpush3.bf16.msra.mxu1 %v3169_v34  ;;  %2353 = vmatprep.mubr.msk.bf16.mxu1 %vm2656_vm0, %v2655_v0 }
 0xef8   :  { %2339 = vmatprep.subr.bf16.mxu1 %v2655_v0 }
 0xefb   :  { %2340 = vmatpush3.bf16.msra.mxu1 %v3176_v37 }
 0xefc   :  { %2341 = vmatprep.subr.bf16.mxu1 %v2655_v0 }
 0xeff   :  { %2342 = vmatpush3.bf16.msra.mxu1 %v3183_v39 }
 0xf00   :  { %2343 = vmatprep.subr.bf16.mxu1 %v2655_v0 }
 0xf03   :  { %2344 = vmatpush3.bf16.msra.mxu1 %v3190_v40 }
 0xf04   :  { %2345 = vmatprep.subr.bf16.mxu1 %v2655_v0 }
 0xf07   :  { %2346 = vmatpush3.bf16.msra.mxu1 %v3197_v41 }
 0xf08   :  { %2347 = vmatprep.subr.bf16.mxu1 %v2655_v0 }
 0xf0b   :  { %2348 = vmatpush3.bf16.msra.mxu1 %v3204_v42 }
 0xf0c   :  { %2349 = vmatprep.subr.bf16.mxu1 %v2655_v0 }
 0xf0f   :  { %2350 = vmatpush3.bf16.msra.mxu1 %v3211_v43 }
 0xf10   :  { %2351 = vmatprep.subr.bf16.mxu1 %v2655_v0 }
 0xf13   :  { %2352 = vmatpush3.bf16.msra.mxu1 %v3218_v44 }
 0xf14   :  { %2377 = vmatprep.subr.bf16.mxu1 %v2655_v0 }
 0xfc9   :  { %v1290_v50 = vpop.f32.mrb[24].mxu1 }
 0xfca   :  { %v1296_v30 = vadd.f32 %v1290_v50, %v3338_v15  ;;  %v2315_v33 = vpop.f32.mrb[25].mxu1 }
 0xfcb   :  { %v1293_v45 = vpop.f32.mrb[26].mxu1 }
 0xfcc   :  { %v1832_v46 = vmul.f32 -1.442695, %v1296_v30  ;;  %v2316_v47 = vpop.f32.mrb[27].mxu1 }
 0xfce   :  { %2607 = vpow2.f32 %v1832_v46 }
 0xfcf   :  { %2609 = vtanh.f32 %v1296_v30 }
 0xfd8   :  { %v2608_v48 = vpop.eup %2607 }
 0xfd9   :  { %v1300_v51 = vadd.f32 1.0, %v2608_v48  ;;  %v2610_v52 = vpop.eup %2609 }
 0xfdb   :  { %2611 = vrcp.f32 %v1300_v51  ;;  %v64_v51 = vld [vmem:[%s3624_s2 + $0x18] sm:$0xff] }
 0xfe5   :  { %v2612_v55 = vpop.eup %2611 }
 0xfe6   :  { %v1304_v60 = vsel %vm44_vm2, %v2612_v55, %v2610_v52 }
 0xfe7   :  { %1309 = vrot.lane.b32.xlu1 %v1304_v60, %s2660_s0  ;;  %1305 = vrot.lane.b32.xlu0 %v1304_v60, %s2659_s25 }
 0xfeb   :  { %1307 = vrot.lane.b32.xlu0 %v1304_v60, %s2658_s24 }
0x1059   :  { %v1310_v15 = vpop.permute.xlu1 %1309  ;;  %v1306_v61 = vpop.permute.xlu0 %1305 }
0x105a   :  { %v1312_v62 = vmul.f32 %v1310_v15, %v1304_v60  ;;  %v1311_v3 = vmul.f32 %v1306_v61, %v1254_v23 }
0x105c   :  { %v1313_v4 = vadd.f32 %v1312_v62, %v1311_v3 }
0x105d   :  { %v1308_v2 = vpop.permute.xlu0 %1307 }
0x105e   :  { %2613 = vtanh.f32 %v1313_v4  ;;  %v1320_v6 = vsel %vm55_vm6, %v1313_v4, %v1254_v23 }
0x1068   :  { %v2614_v31 = vpop.eup %2613 }
0x1069   :  { %v1315_v63 = vmul.f32 %v2614_v31, %v1308_v2 }
0x106b   :  { %v1316_v10 = vsel %vm55_vm6, %v1315_v63, 0.0  ;;  %v1319_v14 = vsel %vm55_vm6, %v1315_v63, %v1253_v24  ;;  %vm72_vm6 = vcmp.gt.f32.partialorder %v64_v51, 0.0 }
0x106c   :  { %v1317_v36 = vmax.f32 %v1252_v38, %v1316_v10  ;;  %v1321_v9 = vpack.c.bf16 %v1319_v14, %v1319_v14 }
0x106e   :  { %2334 = vmatmul.mubr.bf16.vlgmr.msra.gmra.mrb[32].mxu0 %v1321_v9  ;;  %v1318_v7 = vsel %vm71_vm5, %v1317_v36, %v1252_v38  ;;  %v65_v9 = vld [vmem:[%s3624_s2 + $0x20] sm:$0xff] }
0x106f   :  { %2358 = vmatpush3.bf16.msra.mxu0 %v3169_v34  ;;  %2373 = vmatprep.mubr.msk.bf16.mxu0 %vm2656_vm0, %v2655_v0 }
0x1070   :  { %2359 = vmatprep.subr.bf16.mxu0 %v2655_v0 }
0x1073   :  { %2360 = vmatpush3.bf16.msra.mxu0 %v3176_v37 }
0x1074   :  { %2361 = vmatprep.subr.bf16.mxu0 %v2655_v0 }
0x1077   :  { %2362 = vmatpush3.bf16.msra.mxu0 %v3183_v39 }
0x1078   :  { %2363 = vmatprep.subr.bf16.mxu0 %v2655_v0 }
0x107b   :  { %2364 = vmatpush3.bf16.msra.mxu0 %v3190_v40 }
0x107c   :  { %2365 = vmatprep.subr.bf16.mxu0 %v2655_v0 }
0x107f   :  { %2366 = vmatpush3.bf16.msra.mxu0 %v3197_v41 }
0x1080   :  { %2367 = vmatprep.subr.bf16.mxu0 %v2655_v0 }
0x1083   :  { %2368 = vmatpush3.bf16.msra.mxu0 %v3204_v42 }
0x1084   :  { %2369 = vmatprep.subr.bf16.mxu0 %v2655_v0 }
0x1087   :  { %2370 = vmatpush3.bf16.msra.mxu0 %v3211_v43 }
0x1088   :  { %2371 = vmatprep.subr.bf16.mxu0 %v2655_v0 }
0x108b   :  { %2372 = vmatpush3.bf16.msra.mxu0 %v3218_v44 }
0x108c   :  { %2397 = vmatprep.subr.bf16.mxu0 %v2655_v0 }
0x1141   :  { %v1356_v20 = vpop.f32.mrb[32].mxu0 }
0x1142   :  { %v1362_v12 = vadd.f32 %v1356_v20, %v3340_v17  ;;  %v2335_v21 = vpop.f32.mrb[33].mxu0 }
0x1143   :  { %v1359_v16 = vpop.f32.mrb[34].mxu0 }
0x1144   :  { %v1833_v23 = vmul.f32 -1.442695, %v1362_v12  ;;  %v2336_v25 = vpop.f32.mrb[35].mxu0 }
0x1146   :  { %2615 = vpow2.f32 %v1833_v23 }
0x1147   :  { %2617 = vtanh.f32 %v1362_v12 }
0x1150   :  { %v2616_v18 = vpop.eup %2615 }
0x1151   :  { %v1366_v26 = vadd.f32 1.0, %v2616_v18  ;;  %v2618_v27 = vpop.eup %2617 }
0x1153   :  { %2619 = vrcp.f32 %v1366_v26 }
0x115d   :  { %v2620_v24 = vpop.eup %2619 }
0x115e   :  { %v1370_v28 = vsel %vm44_vm2, %v2620_v24, %v2618_v27 }
0x115f   :  { %1375 = vrot.lane.b32.xlu0 %v1370_v28, %s2660_s0  ;;  %1371 = vrot.lane.b32.xlu1 %v1370_v28, %s2659_s25 }
0x1163   :  { %1373 = vrot.lane.b32.xlu1 %v1370_v28, %s2658_s24 }
0x11d1   :  { %v1376_v17 = vpop.permute.xlu0 %1375  ;;  %v1372_v50 = vpop.permute.xlu1 %1371 }
0x11d2   :  { %v1378_v30 = vmul.f32 %v1376_v17, %v1370_v28  ;;  %v1377_v33 = vmul.f32 %v1372_v50, %v1320_v6 }
0x11d4   :  { %v1379_v45 = vadd.f32 %v1378_v30, %v1377_v33  ;;  %v66_v33 = vld [vmem:[%s3624_s2 + $0x28] sm:$0xff] }
0x11d5   :  { %v1374_v48 = vpop.permute.xlu1 %1373 }
0x11d6   :  { %2621 = vtanh.f32 %v1379_v45  ;;  %v1386_v46 = vsel %vm56_vm7, %v1379_v45, %v1320_v6 }
0x11e0   :  { %v2622_v47 = vpop.eup %2621 }
0x11e1   :  { %v1381_v52 = vmul.f32 %v2622_v47, %v1374_v48 }
0x11e3   :  { %v1382_v55 = vsel %vm56_vm7, %v1381_v52, 0.0  ;;  %v1385_v60 = vsel %vm56_vm7, %v1381_v52, %v1319_v14  ;;  %vm73_vm7 = vcmp.gt.f32.partialorder %v65_v9, 0.0  ;;  %v1651_v9 = vld [vmem:[%s3625_s10] sm:$0xff] }
0x11e4   :  { %v1383_v15 = vmax.f32 %v1318_v7, %v1382_v55  ;;  %v1387_v61 = vpack.c.bf16 %v1385_v60, %v1385_v60 }
0x11e6   :  { %2354 = vmatmul.mubr.bf16.vlgmr.msra.gmra.mrb[28].mxu1 %v1387_v61  ;;  %v1384_v62 = vsel %vm72_vm6, %v1383_v15, %v1318_v7 }
0x11e7   :  { %2378 = vmatpush3.bf16.msra.mxu1 %v3169_v34  ;;  %2393 = vmatprep.mubr.msk.bf16.mxu1 %vm2656_vm0, %v2655_v0 }
0x11e8   :  { %2379 = vmatprep.subr.bf16.mxu1 %v2655_v0 }
0x11eb   :  { %2380 = vmatpush3.bf16.msra.mxu1 %v3176_v37 }
0x11ec   :  { %2381 = vmatprep.subr.bf16.mxu1 %v2655_v0 }
0x11ef   :  { %2382 = vmatpush3.bf16.msra.mxu1 %v3183_v39 }
0x11f0   :  { %2383 = vmatprep.subr.bf16.mxu1 %v2655_v0 }
0x11f3   :  { %2384 = vmatpush3.bf16.msra.mxu1 %v3190_v40 }
0x11f4   :  { %2385 = vmatprep.subr.bf16.mxu1 %v2655_v0 }
0x11f7   :  { %2386 = vmatpush3.bf16.msra.mxu1 %v3197_v41 }
0x11f8   :  { %2387 = vmatprep.subr.bf16.mxu1 %v2655_v0 }
0x11fb   :  { %2388 = vmatpush3.bf16.msra.mxu1 %v3204_v42 }
0x11fc   :  { %2389 = vmatprep.subr.bf16.mxu1 %v2655_v0 }
0x11ff   :  { %2390 = vmatpush3.bf16.msra.mxu1 %v3211_v43 }
0x1200   :  { %2391 = vmatprep.subr.bf16.mxu1 %v2655_v0 }
0x1203   :  { %2392 = vmatpush3.bf16.msra.mxu1 %v3218_v44 }
0x12b9   :  { %v1422_v22 = vpop.f32.mrb[28].mxu1 }
0x12ba   :  { %v1428_v3 = vadd.f32 %v1422_v22, %v3344_v29  ;;  %v2355_v4 = vpop.f32.mrb[29].mxu1 }
0x12bb   :  { %v1425_v6 = vpop.f32.mrb[30].mxu1 }
0x12bc   :  { %v1834_v8 = vmul.f32 -1.442695, %v1428_v3  ;;  %v2356_v54 = vpop.f32.mrb[31].mxu1 }
0x12be   :  { %2623 = vpow2.f32 %v1834_v8 }
0x12bf   :  { %2625 = vtanh.f32 %v1428_v3 }
0x12c8   :  { %v2624_v11 = vpop.eup %2623 }
0x12c9   :  { %v1432_v13 = vadd.f32 1.0, %v2624_v11  ;;  %v2626_v1 = vpop.eup %2625 }
0x12cb   :  { %2627 = vrcp.f32 %v1432_v13 }
0x12d5   :  { %v2628_v53 = vpop.eup %2627 }
0x12d6   :  { %v1436_v31 = vsel %vm44_vm2, %v2628_v53, %v2626_v1 }
0x12d7   :  { %1441 = vrot.lane.b32.xlu1 %v1436_v31, %s2660_s0  ;;  %1437 = vrot.lane.b32.xlu0 %v1436_v31, %s2659_s25 }
0x12db   :  { %1439 = vrot.lane.b32.xlu0 %v1436_v31, %s2658_s24 }
0x1349   :  { %v1442_v29 = vpop.permute.xlu1 %1441  ;;  %v1438_v2 = vpop.permute.xlu0 %1437 }
0x134a   :  { %v1444_v5 = vmul.f32 %v1442_v29, %v1436_v31  ;;  %v1443_v63 = vmul.f32 %v1438_v2, %v1386_v46  ;;  %v67_v29 = vld [vmem:[%s3624_s2 + $0x30] sm:$0xff] }
0x134c   :  { %v1445_v38 = vadd.f32 %v1444_v5, %v1443_v63 }
0x134d   :  { %v1440_v36 = vpop.permute.xlu0 %1439 }
0x134e   :  { %2629 = vtanh.f32 %v1445_v38  ;;  %v1452_v10 = vsel %vm57_vm8, %v1445_v38, %v1386_v46 }
0x1358   :  { %v2630_v14 = vpop.eup %2629 }
0x1359   :  { %v1447_v7 = vmul.f32 %v2630_v14, %v1440_v36  ;;  %v2661_v36 = vmov 0.0|0.0  }
0x135a   :  { %2452 = vmatprep.subr.bf16.mxu1 %v2661_v36 }
0x135b   :  { %v1448_v20 = vsel %vm57_vm8, %v1447_v7, 0.0  ;;  %v1451_v12 = vsel %vm57_vm8, %v1447_v7, %v1385_v60  ;;  %vm74_vm8 = vcmp.gt.f32.partialorder %v66_v33, 0.0  ;;  %v1652_v7 = vld [vmem:[%s3625_s10 + $0x8] sm:$0xff] }
0x135c   :  { %v1449_v21 = vmax.f32 %v1384_v62, %v1448_v20  ;;  %v1453_v16 = vpack.c.bf16 %v1451_v12, %v1451_v12  ;;  %v2453_v20 = vpack.c.bf16 %v1652_v7, %v1651_v9 }
0x135e   :  { %2374 = vmatmul.mubr.bf16.vlgmr.msra.gmra.mrb[36].mxu0 %v1453_v16  ;;  %v1450_v23 = vsel %vm73_vm7, %v1449_v21, %v1384_v62  ;;  %v1655_v16 = vld [vmem:[%s3625_s10 + $0x20] sm:$0xff] }
0x135f   :  { %2398 = vmatpush3.bf16.msra.mxu0 %v3169_v34  ;;  %2413 = vmatprep.mubr.msk.bf16.mxu0 %vm2656_vm0, %v2655_v0 }
0x1360   :  { %2399 = vmatprep.subr.bf16.mxu0 %v2655_v0 }
0x1363   :  { %2400 = vmatpush3.bf16.msra.mxu0 %v3176_v37 }
0x1364   :  { %2401 = vmatprep.subr.bf16.mxu0 %v2655_v0 }
0x1367   :  { %2402 = vmatpush3.bf16.msra.mxu0 %v3183_v39 }
0x1368   :  { %2403 = vmatprep.subr.bf16.mxu0 %v2655_v0 }
0x136b   :  { %2404 = vmatpush3.bf16.msra.mxu0 %v3190_v40 }
0x136c   :  { %2405 = vmatprep.subr.bf16.mxu0 %v2655_v0 }
0x136f   :  { %2406 = vmatpush3.bf16.msra.mxu0 %v3197_v41 }
0x1370   :  { %2407 = vmatprep.subr.bf16.mxu0 %v2655_v0 }
0x1373   :  { %2408 = vmatpush3.bf16.msra.mxu0 %v3204_v42 }
0x1374   :  { %2409 = vmatprep.subr.bf16.mxu0 %v2655_v0 }
0x1377   :  { %2410 = vmatpush3.bf16.msra.mxu0 %v3211_v43 }
0x1378   :  { %2411 = vmatprep.subr.bf16.mxu0 %v2655_v0 }
0x137b   :  { %2412 = vmatpush3.bf16.msra.mxu0 %v3218_v44 }
0x1431   :  { %v1488_v57 = vpop.f32.mrb[36].mxu0 }
0x1432   :  { %v1494_v34 = vadd.f32 %v1488_v57, %v3348_v19  ;;  %v2375_v37 = vpop.f32.mrb[37].mxu0 }
0x1433   :  { %v1491_v39 = vpop.f32.mrb[38].mxu0 }
0x1434   :  { %v1835_v40 = vmul.f32 -1.442695, %v1494_v34  ;;  %v2376_v25 = vpop.f32.mrb[39].mxu0 }
0x1436   :  { %2631 = vpow2.f32 %v1835_v40 }
0x1437   :  { %2633 = vtanh.f32 %v1494_v34 }
0x1440   :  { %v2632_v41 = vpop.eup %2631 }
0x1441   :  { %v1498_v18 = vadd.f32 1.0, %v2632_v41  ;;  %v2634_v42 = vpop.eup %2633 }
0x1443   :  { %2635 = vrcp.f32 %v1498_v18 }
0x144d   :  { %v2636_v26 = vpop.eup %2635 }
0x144e   :  { %v1502_v43 = vsel %vm44_vm2, %v2636_v26, %v2634_v42  ;;  %v1657_v26 = vld [vmem:[%s3625_s10 + $0x30] sm:$0xff] }
0x144f   :  { %1507 = vrot.lane.b32.xlu0 %v1502_v43, %s2660_s0  ;;  %1503 = vrot.lane.b32.xlu1 %v1502_v43, %s2659_s25 }
0x1453   :  { %1505 = vrot.lane.b32.xlu1 %v1502_v43, %s2658_s24 }
0x14c1   :  { %v1508_v44 = vpop.permute.xlu0 %1507  ;;  %v1504_v19 = vpop.permute.xlu1 %1503 }
0x14c2   :  { %v1510_v27 = vmul.f32 %v1508_v44, %v1502_v43  ;;  %v1509_v24 = vmul.f32 %v1504_v19, %v1452_v10  ;;  %v1658_v43 = vld [vmem:[%s3625_s10 + $0x38] sm:$0xff]  ;;  %v1660_v19 = vld [vmem:[%s3625_s10 + $0x48] sm:$0xff] }
0x14c3   :  { %v2462_v44 = vpack.c.bf16 %v1658_v43, %v1657_v26 }
0x14c4   :  { %v1511_v28 = vadd.f32 %v1510_v27, %v1509_v24  ;;  %v1661_v24 = vld [vmem:[%s3625_s10 + $0x50] sm:$0xff] }
0x14c5   :  { %v1506_v30 = vpop.permute.xlu1 %1505 }
0x14c6   :  { %2637 = vtanh.f32 %v1511_v28  ;;  %v1518_v17 = vsel %vm58_vm9, %v1511_v28, %v1452_v10  ;;  %v1662_v28 = vld [vmem:[%s3625_s10 + $0x58] sm:$0xff] }
0x14d0   :  { %v2638_v50 = vpop.eup %2637 }
0x14d1   :  { %v1513_v45 = vmul.f32 %v2638_v50, %v1506_v30 }
0x14d3   :  { %v1514_v46 = vsel %vm58_vm9, %v1513_v45, 0.0  ;;  %v1517_v47 = vsel %vm58_vm9, %v1513_v45, %v1451_v12  ;;  %v1654_v12 = vld [vmem:[%s3625_s10 + $0x18] sm:$0xff]  ;;  %v1663_v45 = vld [vmem:[%s3625_s10 + $0x60] sm:$0xff] }
0x14d4   :  { %v1515_v48 = vmax.f32 %v1450_v23, %v1514_v46  ;;  %v1519_v51 = vpack.c.bf16 %v1517_v47, %v1517_v47  ;;  %v2456_v21 = vpack.c.bf16 %v1654_v12, %v1653_v56  ;;  %v1664_v46 = vld [vmem:[%s3625_s10 + $0x68] sm:$0xff] }
0x14d6   :  { %2394 = vmatmul.mubr.bf16.vlgmr.msra.gmra.mrb[32].mxu1 %v1519_v51  ;;  %v1516_v52 = vsel %vm74_vm8, %v1515_v48, %v1450_v23  ;;  %v1656_v23 = vld [vmem:[%s3625_s10 + $0x28] sm:$0xff]  ;;  %v1666_v48 = vld [vmem:[%s3625_s10 + $0x78] sm:$0xff] }
0x14d7   :  { %2449 = vmatprep.mubr.msk.f32.mxu1 %vm2656_vm0, %v2655_v0  ;;  %vm75_vm0 = vcmp.gt.f32.partialorder %v67_v29, 0.0  ;;  %2454 = vmatpush3.bf16.msra.mxu1 %v2453_v20  ;;  %v2459_v57 = vpack.c.bf16 %v1656_v23, %v1655_v16  ;;  %v2474_v51 = vpack.c.bf16 %v1666_v48, %v1665_v35 }
0x14d8   :  { %2455 = vmatprep.subr.bf16.mxu1 %v2661_v36 }
0x14db   :  { %2457 = vmatpush3.bf16.msra.mxu1 %v2456_v21 }
0x14dc   :  { %2458 = vmatprep.subr.bf16.mxu1 %v2661_v36 }
0x14df   :  { %2460 = vmatpush3.bf16.msra.mxu1 %v2459_v57 }
0x14e0   :  { %2461 = vmatprep.subr.bf16.mxu1 %v2661_v36 }
0x14e3   :  { %2463 = vmatpush3.bf16.msra.mxu1 %v2462_v44 }
0x14e4   :  { %2464 = vmatprep.subr.bf16.mxu1 %v2661_v36 }
0x15a9   :  { %v1554_v55 = vpop.f32.mrb[32].mxu1 }
0x15aa   :  { %v1560_v60 = vadd.f32 %v1554_v55, %v3342_v58  ;;  %v2395_v15 = vpop.f32.mrb[33].mxu1 }
0x15ab   :  { %v1557_v61 = vpop.f32.mrb[34].mxu1 }
0x15ac   :  { %v1836_v62 = vmul.f32 -1.442695, %v1560_v60  ;;  %v2396_v22 = vpop.f32.mrb[35].mxu1 }
0x15ae   :  { %2639 = vpow2.f32 %v1836_v62 }
0x15af   :  { %2641 = vtanh.f32 %v1560_v60 }
0x15b8   :  { %v2640_v3 = vpop.eup %2639 }
0x15b9   :  { %v1564_v4 = vadd.f32 1.0, %v2640_v3  ;;  %v2642_v59 = vpop.eup %2641  ;;  %v68_v3 = vld [vmem:[%s3624_s2 + $0x38] sm:$0xff] }
0x15bb   :  { %2643 = vrcp.f32 %v1564_v4 }
0x15c5   :  { %v2644_v6 = vpop.eup %2643 }
0x15c6   :  { %v1568_v8 = vsel %vm44_vm2, %v2644_v6, %v2642_v59 }
0x15c7   :  { %1573 = vrot.lane.b32.xlu1 %v1568_v8, %s2660_s0  ;;  %1569 = vrot.lane.b32.xlu0 %v1568_v8, %s2659_s25 }
0x15cb   :  { %1571 = vrot.lane.b32.xlu0 %v1568_v8, %s2658_s24 }
0x1639   :  { %v1574_v0 = vpop.permute.xlu1 %1573  ;;  %v1570_v58 = vpop.permute.xlu0 %1569 }
0x163a   :  { %v1576_v54 = vmul.f32 %v1574_v0, %v1568_v8  ;;  %v1575_v11 = vmul.f32 %v1570_v58, %v1518_v17  ;;  %v1838_v0 = vld [vmem:[%s3626_s11] ss:$0 sm:$0xff] }
0x163c   :  { %v1577_v13 = vadd.f32 %v1576_v54, %v1575_v11 }
0x163d   :  { %v1572_v31 = vpop.permute.xlu0 %1571 }
0x163e   :  { %2645 = vtanh.f32 %v1577_v13  ;;  %v3536_v1 = vsel %vm59_vm10, %v1577_v13, %v1518_v17  ;;  %v2468_v17 = vpack.c.bf16 %v1662_v28, %v1661_v24 }
0x1648   :  { %v2646_v53 = vpop.eup %2645 }
0x1649   :  { %v1579_v2 = vmul.f32 %v2646_v53, %v1572_v31 }
0x164b   :  { %v1580_v5 = vsel %vm59_vm10, %v1579_v2, 0.0  ;;  %v1583_v63 = vsel %vm59_vm10, %v1579_v2, %v1517_v47  ;;  %v2471_v47 = vpack.c.bf16 %v1664_v46, %v1663_v45  ;;  %vm1744_vm10 = vcmask 23552  }
0x164c   :  { %v1581_v38 = vmax.f32 %v1516_v52, %v1580_v5  ;;  %v1585_v10 = vpack.c.bf16 %v1583_v63, %v1583_v63 }
0x164e   :  { %2414 = vmatmul.mubr.bf16.vlgmr.msra.gmra.mrb[40].mxu0 %v1585_v10  ;;  %v3545_v14 = vsel %vm75_vm0, %v1581_v38, %v1516_v52 }
0x1721   :  { %v1620_v34 = vpop.f32.mrb[40].mxu0 }
0x1722   :  { %v1626_v37 = vadd.f32 %v1620_v34, %v3346_v32  ;;  %v2415_v39 = vpop.f32.mrb[41].mxu0  ;;  %v1659_v32 = vld [vmem:[%s3625_s10 + $0x40] sm:$0xff] }
0x1723   :  { %v1623_v40 = vpop.f32.mrb[42].mxu0  ;;  %v2465_v27 = vpack.c.bf16 %v1660_v19, %v1659_v32 }
0x1724   :  { %v1837_v25 = vmul.f32 -1.442695, %v1626_v37  ;;  %v2416_v41 = vpop.f32.mrb[43].mxu0 }
0x1725   :  { %2466 = vmatpush3.bf16.msra.mxu1 %v2465_v27 }
0x1726   :  { %2647 = vpow2.f32 %v1837_v25  ;;  %2467 = vmatprep.subr.bf16.mxu1 %v2661_v36 }
0x1727   :  { %2649 = vtanh.f32 %v1626_v37 }
0x1729   :  { %2469 = vmatpush3.bf16.msra.mxu1 %v2468_v17 }
0x172a   :  { %2470 = vmatprep.subr.bf16.mxu1 %v2661_v36 }
0x172d   :  { %2472 = vmatpush3.bf16.msra.mxu1 %v2471_v47 }
0x172e   :  { %2473 = vmatprep.subr.bf16.mxu1 %v2661_v36 }
0x1730   :  { %v2648_v18 = vpop.eup %2647 }
0x1731   :  { %v1630_v42 = vadd.f32 1.0, %v2648_v18  ;;  %v2650_v50 = vpop.eup %2649  ;;  %2475 = vmatpush3.bf16.msra.mxu1 %v2474_v51 }
0x1733   :  { %2651 = vrcp.f32 %v1630_v42 }
0x173d   :  { %v2652_v30 = vpop.eup %2651 }
0x173e   :  { %v1634_v33 = vsel %vm44_vm2, %v2652_v30, %v2650_v50  ;;  %vm76_vm2 = vcmp.gt.f32.partialorder %v68_v3, 0.0 }
0x173f   :  { %1639 = vrot.lane.b32.xlu0 %v1634_v33, %s2660_s0  ;;  %1635 = vrot.lane.b32.xlu1 %v1634_v33, %s2659_s25 }
0x1743   :  { %1637 = vrot.lane.b32.xlu1 %v1634_v33, %s2658_s24 }
0x17b1   :  { %v1640_v52 = vpop.permute.xlu0 %1639  ;;  %v1636_v55 = vpop.permute.xlu1 %1635 }
0x17b2   :  { %v1642_v60 = vmul.f32 %v1640_v52, %v1634_v33  ;;  %v1641_v15 = vmul.f32 %v1636_v55, %v3536_v1 }
0x17b4   :  { %v1643_v61 = vadd.f32 %v1642_v60, %v1641_v15 }
0x17b5   :  { %v1638_v22 = vpop.permute.xlu1 %1637 }
0x17b6   :  { %2653 = vtanh.f32 %v1643_v61 }
0x17c0   :  { %v2654_v62 = vpop.eup %2653 }
0x17c1   :  { %v1645_v4 = vmul.f32 %v2654_v62, %v1638_v22 }
0x17c3   :  { %v1646_v59 = vsel %vm60_vm11, %v1645_v4, 0.0 }
0x17c4   :  { %v1647_v6 = vmax.f32 %v3545_v14, %v1646_v59 }
0x17c6   :  { %v1648_v8 = vsel %vm76_vm2, %v1647_v6, %v3545_v14 }
0x17c7   :  { %vm1649_vm9 = vcmp.gt.f32.partialorder %v1648_v8, -1e+29 }
0x17c8   :  { %2450 = vmatmul.mubr.msk.f32.vlgmr.msra.gmra.mrb[36].mxu1 %vm1649_vm9, %v1648_v8 }
0x189b   :  { %v1740_v58 = vpop.f32.mrb[36].mxu1 }
0x189c   :  { %v1741_v54 = vadd.f32 %v1838_v0, %v1740_v58  ;;  %v2451_v11 = vpop.f32.mrb[37].mxu1 }
0x189e   :  { %1745 = vst.msk [vmem:[%s3627_s12] sm:$0xff] %vm1744_vm10, %v1741_v54 }

</bundles_post_ra>
